<compile_context>
chip_gen: v7x
topology: tpu7x:2x2x1
jax: 0.10.0
libtpu: 0.0.40
codegen_flags: <defaults>
</compile_context>

<pallas_src>
import functools

import jax
import jax.numpy as jnp
from jax.experimental import pallas as pl
from jax.experimental.pallas import tpu as pltpu


def _round_up(x, m):
    return ((x + m - 1) // m) * m


def _factor_decoder_kernel(
    e_ref,      # [TM, D]     caller dtype (f32); cast to compute dtype in-kernel
    wbig_ref,   # [D, D+2K]   bf16/f32: [W_proj | W_beta*mu_z | W_beta*sigma_z]
    bbig_ref,   # [1, D+2K]   f32:      [b_proj | b_beta*mu_z | b_beta*sigma_z]
    whead_ref,  # [D, 2]      bf16/f32  (col 0 = w_mu, col 1 = w_sigma)
    bhead_ref,  # [1, 2]      f32
    out_ref,    # [TM, 2]     f32       (col 0 = mu_y, col 1 = sigma_y)
    *,
    d: int,
    k: int,
):
    # Cast the streamed tile to the compute dtype in VMEM (free under the DMA).
    e = e_ref[...].astype(wbig_ref.dtype)

    # Single fused MXU pass: projection + (z-scaled) beta columns together.
    r = jnp.dot(e, wbig_ref[...], preferred_element_type=jnp.float32) + bbig_ref[...]

    h = r[:, :d]
    h = jnp.maximum(h, 0.01 * h)                  # nn.LeakyReLU(negative_slope=0.01)
    beta_mu = r[:, d:d + k]                       # beta * mu_z      (z folded into W_big)
    beta_sig = r[:, d + k:d + 2 * k]              # beta * sigma_z

    # Fused [D,2] head: (mu_alpha, sigma_alpha-preactivation) in one matmul.
    head = jnp.dot(h.astype(whead_ref.dtype), whead_ref[...],
                   preferred_element_type=jnp.float32) + bhead_ref[...]
    mu_alpha = head[:, 0:1]
    s_pre = head[:, 1:2]
    # softplus with PyTorch-style overflow guard (threshold=20)
    sigma_alpha = jnp.where(
        s_pre > 20.0, s_pre, jnp.log1p(jnp.exp(jnp.minimum(s_pre, 20.0))))

    # z was folded into the weight columns, so the combine is two row-sums.
    mu_y = mu_alpha + jnp.sum(beta_mu, axis=-1, keepdims=True)
    var_y = jnp.square(sigma_alpha) + jnp.sum(
        jnp.square(beta_sig), axis=-1, keepdims=True)
    sigma_y = jnp.sqrt(var_y)

    # Single store slab for both outputs.
    out_ref[...] = jnp.concatenate([mu_y, sigma_y], axis=-1).astype(out_ref.dtype)


def _choose_tile_rows(ns, d, itemsize, target_tile_bytes):
    """Tile rows sized by bytes of the streamed e tile (~1-4 MiB per grid step)."""
    align = 256                                   # bf16 sublane packing + MXU row tile
    tm = max(align, ((target_tile_bytes // max(d * itemsize, 1)) // align) * align)
    # Keep >= 8 grid steps for large Ns so the DMA pipeline / megacore axis has
    # work to overlap (and the grid is comfortably >= 2 for v7x's two TCs).
    min_steps = 8
    if ns > min_steps * align:
        tm = min(tm, _round_up(pl.cdiv(ns, min_steps), align))
    # Never let the block exceed the array extent: clamp (rounding down) so only
    # the last grid step can be ragged; Pallas masks its partial store.
    if ns >= 16:
        tm = min(tm, (ns // 16) * 16)
    else:
        tm = _round_up(ns, 8)
    return max(tm, 8)


def factor_decoder(z, e, params, *, tile_m=None, use_bf16=True,
                   target_tile_bytes=2 << 20):
    """z = (mu_z [K], sigma_z [K]); e [Ns, D]. Returns (mu_y [Ns], sigma_y [Ns])."""
    mu_z, sigma_z = z
    ns, d = e.shape
    k = mu_z.shape[0]
    compute_dtype = jnp.bfloat16 if use_bf16 else jnp.float32
    itemsize = jnp.dtype(e.dtype).itemsize

    if tile_m is None:
        tm = _choose_tile_rows(ns, d, itemsize, target_tile_bytes)
    else:
        if ns >= 16:
            tm = max(16, (min(tile_m, ns) // 16) * 16)   # 16-aligned, never > Ns
        else:
            tm = _round_up(ns, 8)

    # ---- fold z and the beta layer into one fused weight / bias (wrapper-side) ----
    mu_z_f = mu_z.astype(jnp.float32)
    sig_z_f = sigma_z.astype(jnp.float32)
    w_big = jnp.concatenate(
        [params["w_proj"],
         params["w_beta"] * mu_z_f[None, :],
         params["w_beta"] * sig_z_f[None, :]], axis=1).astype(compute_dtype)
    b_big = jnp.concatenate(
        [params["b_proj"],
         params["b_beta"] * mu_z_f,
         params["b_beta"] * sig_z_f]).reshape(1, d + 2 * k).astype(jnp.float32)

    # Fused [D,2] head weight kept in the compute dtype (one MXU pass).
    w_head = jnp.concatenate(
        [params["w_mu"], params["w_sigma"]], axis=1).astype(compute_dtype)
    b_head = jnp.concatenate(
        [params["b_mu"], params["b_sigma"]]).reshape(1, 2).astype(jnp.float32)

    # ---- VMEM budget: raise the scoped limit only when needed (<= 56 MiB for v7x) ----
    w_item = 2 if use_bf16 else 4
    est_vmem = (2 * tm * d * itemsize                              # e (double-buffered)
                + 2 * tm * 2 * 4                                   # out (double-buffered)
                + 2 * (d * (d + 2 * k) + 2 * d) * w_item           # W_big + W_head
                + 2 * ((d + 2 * k) + 2) * 4)                       # biases
    vmem_limit = None
    if est_vmem > (16 << 20):          # above the v5e default scoped VMEM
        vmem_limit = int(min(_round_up(2 * est_vmem, 1 << 20), 56 << 20))

    grid = (pl.cdiv(ns, tm),)
    tile_map = lambda i: (i, 0)        # e / out: streamed along Ns
    const_map = lambda i: (0, 0)       # weights / biases: VMEM-resident

    out = pl.pallas_call(
        functools.partial(_factor_decoder_kernel, d=d, k=k),
        out_shape=jax.ShapeDtypeStruct((ns, 2), jnp.float32),
        grid=grid,
        in_specs=[
            pl.BlockSpec((tm, d), tile_map),            # e (no wrapper pad/cast)
            pl.BlockSpec((d, d + 2 * k), const_map),    # W_big
            pl.BlockSpec((1, d + 2 * k), const_map),    # b_big
            pl.BlockSpec((d, 2), const_map),            # W_head
            pl.BlockSpec((1, 2), const_map),            # b_head
        ],
        out_specs=pl.BlockSpec((tm, 2), tile_map),
        compiler_params=pltpu.CompilerParams(
            dimension_semantics=("parallel",),
            vmem_limit_bytes=vmem_limit,
        ),
    )(e, w_big, b_big, w_head, b_head)

    return out[:, 0], out[:, 1]


def init_params(key, embedding_dim, K):
    """Deterministic parameter init (shapes mirror the PyTorch module).

    Weights are stored transposed ([in, out]) relative to nn.Linear so the
    kernel does x @ W directly.
    """
    ks = jax.random.split(key, 8)
    D = embedding_dim
    scale = 1.0 / jnp.sqrt(D)
    return {
        "w_proj":  jax.random.uniform(ks[0], (D, D), jnp.float32, -scale, scale),
        "b_proj":  jax.random.uniform(ks[1], (D,),   jnp.float32, -scale, scale),
        "w_mu":    jax.random.uniform(ks[2], (D, 1), jnp.float32, -scale, scale),
        "b_mu":    jax.random.uniform(ks[3], (1,),   jnp.float32, -scale, scale),
        "w_sigma": jax.random.uniform(ks[4], (D, 1), jnp.float32, -scale, scale),
        "b_sigma": jax.random.uniform(ks[5], (1,),   jnp.float32, -scale, scale),
        "w_beta":  jax.random.uniform(ks[6], (D, K), jnp.float32, -scale, scale),
        "b_beta":  jax.random.uniform(ks[7], (K,),   jnp.float32, -scale, scale),
    }


def _reference(z, e, p):
    """Pure-JAX f32 reference mirroring the PyTorch FactorDecoder.forward (unfused)."""
    mu_z, sigma_z = z
    hp = jax.lax.Precision.HIGHEST
    h = jnp.dot(e, p["w_proj"], precision=hp) + p["b_proj"]
    h = jnp.where(h > 0, h, 0.01 * h)
    mu_alpha = jnp.dot(h, p["w_mu"], precision=hp) + p["b_mu"]
    sigma_alpha = jax.nn.softplus(jnp.dot(h, p["w_sigma"], precision=hp) + p["b_sigma"])
    beta = jnp.dot(e, p["w_beta"], precision=hp) + p["b_beta"]
    mu_y = jnp.squeeze(mu_alpha + jnp.dot(beta, mu_z[:, None], precision=hp), -1)
    sigma_y = jnp.squeeze(
        jnp.sqrt(jnp.square(sigma_alpha)
                 + jnp.dot(jnp.square(beta), jnp.square(sigma_z)[:, None], precision=hp)),
        -1)
    return mu_y, sigma_y


if __name__ == "__main__":
    # Small, deterministic shapes; Ns deliberately not a multiple of the tile so
    # the ragged (masked) last tile is exercised without any wrapper-side padding.
    Ns, D, K = 200, 32, 4
    key = jax.random.PRNGKey(0)
    k_e, k_mu, k_sig, k_p = jax.random.split(key, 4)

    e = jax.random.normal(k_e, (Ns, D), jnp.float32)
    mu_z = jax.random.normal(k_mu, (K,), jnp.float32)
    sigma_z = jnp.abs(jax.random.normal(k_sig, (K,), jnp.float32)) + 0.1

    params = init_params(k_p, D, K)
    mu_ref, sig_ref = _reference((mu_z, sigma_z), e, params)

    # Default byte-sized tile, bf16-fed MXU path (f32 accumulation / epilogue).
    mu_y, sigma_y = factor_decoder((mu_z, sigma_z), e, params, use_bf16=True)
    jax.block_until_ready((mu_y, sigma_y))
    assert mu_y.shape == (Ns,) and sigma_y.shape == (Ns,)
    assert jnp.allclose(mu_y, mu_ref, atol=1e-1, rtol=5e-2)
    assert jnp.allclose(sigma_y, sig_ref, atol=1e-1, rtol=5e-2)

    # Multi-step grid (grid=4) with a ragged last tile, pure f32 math.
    mu_y32, sigma_y32 = factor_decoder((mu_z, sigma_z), e, params,
                                       tile_m=64, use_bf16=False)
    jax.block_until_ready((mu_y32, sigma_y32))
    assert mu_y32.shape == (Ns,) and sigma_y32.shape == (Ns,)
    assert jnp.allclose(mu_y32, mu_ref, atol=2e-2, rtol=2e-2)
    assert jnp.allclose(sigma_y32, sig_ref, atol=2e-2, rtol=2e-2)

    print("KERNEL_OK")
</pallas_src>

<mosaic_0001>
module attributes {stable_mosaic.version = 11 : i64} {
  func.func @_factor_decoder_kernel(%arg0: i32, %arg1: memref<192x32xf32, #tpu.memory_space<vmem>>, %arg2: memref<32x40xbf16, #tpu.memory_space<vmem>>, %arg3: memref<1x40xf32, #tpu.memory_space<vmem>>, %arg4: memref<32x2xbf16, #tpu.memory_space<vmem>>, %arg5: memref<1x2xf32, #tpu.memory_space<vmem>>, %arg6: memref<192x2xf32, #tpu.memory_space<vmem>>) attributes {dimension_semantics = [#tpu.dimension_semantics<parallel>], iteration_bounds = array<i64: 2>, scalar_prefetch = 0 : i64, scratch_operands = 0 : i64, tpu.core_type = #tpu.core_type<tc>, window_params = [{transform_indices = @transform_0, window_bounds = array<i64: 192, 32>}, {pipeline_mode = #tpu.pipeline_mode<synchronous>, transform_indices = @transform_1, window_bounds = array<i64: 32, 40>}, {pipeline_mode = #tpu.pipeline_mode<synchronous>, transform_indices = @transform_2, window_bounds = array<i64: 1, 40>}, {pipeline_mode = #tpu.pipeline_mode<synchronous>, transform_indices = @transform_3, window_bounds = array<i64: 32, 2>}, {pipeline_mode = #tpu.pipeline_mode<synchronous>, transform_indices = @transform_4, window_bounds = array<i64: 1, 2>}, {transform_indices = @transform_5, window_bounds = array<i64: 192, 2>}]} {
    %c0 = arith.constant 0 : index
    %c0_0 = arith.constant 0 : index
    %0 = vector.load %arg1[%c0, %c0_0] : memref<192x32xf32, #tpu.memory_space<vmem>>, vector<192x32xf32>
    %1 = arith.truncf %0 : vector<192x32xf32> to vector<192x32xbf16>
    %c0_1 = arith.constant 0 : index
    %c0_2 = arith.constant 0 : index
    %2 = vector.load %arg2[%c0_1, %c0_2] : memref<32x40xbf16, #tpu.memory_space<vmem>>, vector<32x40xbf16>
    %cst = arith.constant dense<0.000000e+00> : vector<192x40xf32>
    %3 = tpu.matmul %1, %2, %cst {dimension_numbers = #tpu.dot_dimension_numbers<[1], [0], [0], [1], [0, 0, 1, 1], [], []>} : vector<192x32xbf16>, vector<32x40xbf16>, vector<192x40xf32> -> vector<192x40xf32>
    %c0_3 = arith.constant 0 : index
    %c0_4 = arith.constant 0 : index
    %4 = vector.load %arg3[%c0_3, %c0_4] : memref<1x40xf32, #tpu.memory_space<vmem>>, vector<1x40xf32>
    %5 = vector.broadcast %4 : vector<1x40xf32> to vector<192x40xf32>
    %6 = arith.addf %3, %5 : vector<192x40xf32>
    %7 = vector.extract_strided_slice %6 {offsets = [0, 0], sizes = [192, 32], strides = [1, 1]} : vector<192x40xf32> to vector<192x32xf32>
    %cst_5 = arith.constant 0.00999999977 : f32
    %8 = vector.broadcast %cst_5 : f32 to vector<192x32xf32>
    %9 = arith.mulf %8, %7 : vector<192x32xf32>
    %10 = arith.maximumf %7, %9 : vector<192x32xf32>
    %11 = vector.extract_strided_slice %6 {offsets = [0, 32], sizes = [192, 4], strides = [1, 1]} : vector<192x40xf32> to vector<192x4xf32>
    %12 = vector.extract_strided_slice %6 {offsets = [0, 36], sizes = [192, 4], strides = [1, 1]} : vector<192x40xf32> to vector<192x4xf32>
    %13 = arith.truncf %10 : vector<192x32xf32> to vector<192x32xbf16>
    %c0_6 = arith.constant 0 : index
    %c0_7 = arith.constant 0 : index
    %14 = vector.load %arg4[%c0_6, %c0_7] : memref<32x2xbf16, #tpu.memory_space<vmem>>, vector<32x2xbf16>
    %cst_8 = arith.constant dense<0.000000e+00> : vector<192x2xf32>
    %15 = tpu.matmul %13, %14, %cst_8 {dimension_numbers = #tpu.dot_dimension_numbers<[1], [0], [0], [1], [0, 0, 1, 1], [], []>} : vector<192x32xbf16>, vector<32x2xbf16>, vector<192x2xf32> -> vector<192x2xf32>
    %c0_9 = arith.constant 0 : index
    %c0_10 = arith.constant 0 : index
    %16 = vector.load %arg5[%c0_9, %c0_10] : memref<1x2xf32, #tpu.memory_space<vmem>>, vector<1x2xf32>
    %17 = vector.broadcast %16 : vector<1x2xf32> to vector<192x2xf32>
    %18 = arith.addf %15, %17 : vector<192x2xf32>
    %19 = vector.extract_strided_slice %18 {offsets = [0, 0], sizes = [192, 1], strides = [1, 1]} : vector<192x2xf32> to vector<192x1xf32>
    %20 = vector.extract_strided_slice %18 {offsets = [0, 1], sizes = [192, 1], strides = [1, 1]} : vector<192x2xf32> to vector<192x1xf32>
    %cst_11 = arith.constant 2.000000e+01 : f32
    %21 = vector.broadcast %cst_11 : f32 to vector<192x1xf32>
    %22 = arith.cmpf ogt, %20, %21 : vector<192x1xf32>
    %cst_12 = arith.constant 2.000000e+01 : f32
    %23 = vector.broadcast %cst_12 : f32 to vector<192x1xf32>
    %24 = arith.minimumf %20, %23 : vector<192x1xf32>
    %25 = math.exp %24 : vector<192x1xf32>
    %26 = math.log1p %25 : vector<192x1xf32>
    %27 = arith.select %22, %20, %26 : vector<192x1xi1>, vector<192x1xf32>
    %cst_13 = arith.constant dense<0.000000e+00> : vector<192xf32>
    %28 = vector.multi_reduction <add>, %11, %cst_13 [1] : vector<192x4xf32> to vector<192xf32>
    %29 = vector.shape_cast %28 : vector<192xf32> to vector<192x1xf32>
    %30 = arith.addf %19, %29 : vector<192x1xf32>
    %31 = arith.mulf %27, %27 : vector<192x1xf32>
    %32 = arith.mulf %12, %12 : vector<192x4xf32>
    %cst_14 = arith.constant dense<0.000000e+00> : vector<192xf32>
    %33 = vector.multi_reduction <add>, %32, %cst_14 [1] : vector<192x4xf32> to vector<192xf32>
    %34 = vector.shape_cast %33 : vector<192xf32> to vector<192x1xf32>
    %35 = arith.addf %31, %34 : vector<192x1xf32>
    %36 = math.sqrt %35 : vector<192x1xf32>
    %37 = tpu.concatenate %30, %36 in 1 : vector<192x1xf32>, vector<192x1xf32> -> vector<192x2xf32>
    %c0_15 = arith.constant 0 : index
    %c0_16 = arith.constant 0 : index
    %38 = vector.load %arg6[%c0_15, %c0_16] : memref<192x2xf32, #tpu.memory_space<vmem>>, vector<192x2xf32>
    tpu.vector_store %arg6[%c0_15, %c0_16], %37 {strides = array<i32>} : memref<192x2xf32, #tpu.memory_space<vmem>>, vector<192x2xf32>,
    return
  }
  func.func @transform_0(%arg0: i32) -> (i32, i32) {
    %c0_i32 = arith.constant 0 : i32
    %c0_i32_0 = arith.constant 0 : i32
    return %arg0, %c0_i32 : i32, i32
  }
  func.func @transform_1(%arg0: i32) -> (i32, i32) {
    %c0_i32 = arith.constant 0 : i32
    %c0_i32_0 = arith.constant 0 : i32
    %c0_i32_1 = arith.constant 0 : i32
    return %c0_i32, %c0_i32_0 : i32, i32
  }
  func.func @transform_2(%arg0: i32) -> (i32, i32) {
    %c0_i32 = arith.constant 0 : i32
    %c0_i32_0 = arith.constant 0 : i32
    %c0_i32_1 = arith.constant 0 : i32
    return %c0_i32, %c0_i32_0 : i32, i32
  }
  func.func @transform_3(%arg0: i32) -> (i32, i32) {
    %c0_i32 = arith.constant 0 : i32
    %c0_i32_0 = arith.constant 0 : i32
    %c0_i32_1 = arith.constant 0 : i32
    return %c0_i32, %c0_i32_0 : i32, i32
  }
  func.func @transform_4(%arg0: i32) -> (i32, i32) {
    %c0_i32 = arith.constant 0 : i32
    %c0_i32_0 = arith.constant 0 : i32
    %c0_i32_1 = arith.constant 0 : i32
    return %c0_i32, %c0_i32_0 : i32, i32
  }
  func.func @transform_5(%arg0: i32) -> (i32, i32) {
    %c0_i32 = arith.constant 0 : i32
    %c0_i32_0 = arith.constant 0 : i32
    return %arg0, %c0_i32 : i32, i32
  }
}

</mosaic_0001>

<bundles_post_ra>
// kernel: tpu_custom_call.1
= control target key start
LH: loop header
LB: loop body
LE: loop exit
PB: predicated region body
PF: predicated region fallthrough
CT: control target
= control target key end

     0   :  { %s2512_s18 = smov 0   ;;  %s2514_s19 = smov 0   ;;  %s3857_s0 = inlined_call_operand.vmem [shape: f32[200,32], index: 0, kind: input, shape index: {}]   ;;  %s3858_s1 = inlined_call_operand.vmem [shape: bf16[32,40], index: 1, kind: input, shape index: {}]   ;;  %s3859_s2 = inlined_call_operand.vmem [shape: f32[1,40], index: 2, kind: input, shape index: {}]   ;;  %s3860_s3 = inlined_call_operand.vmem [shape: bf16[32,2], index: 3, kind: input, shape index: {}]   ;;  %s3861_s4 = inlined_call_operand.vmem [shape: f32[1,2], index: 4, kind: input, shape index: {}]   ;;  %s3862_s5 = inlined_call_operand.vmem [shape: f32[200,2], index: 5, kind: output, shape index: {}]  }
   0x1   :  { %s2516_s20 = smov 0  }
   0x2 LB: > { %s2525_s21 = sadd.s32 4294967295, %s2446_s20   ;;  %s2527_s22 = sadd.s32 1, %s2446_s20   ;;  %s2446_s20 = sphi %s2516_s20, %s3930_s20   ;;  %s2442_s19 = sphi %s2514_s19, %s3929_s19   ;;  %s2438_s18 = sphi %s2512_s18, %s3928_s18  }
   0x3   : > { %s129_s23 = ssub.s32 %s2446_s20, %s2527_s22  ;;  %s132_s24 = sadd.s32 1, %s2442_s19 }
   0x4   : > { %p130_p0 = scmp.eq.s32.totalorder %s129_s23, 0  ;;  %p142_p1 = scmp.ne.s32.totalorder %s2442_s19, %s2438_s18 }
   0x5   : > { %p143_p2 = scmp.eq.s32.totalorder %s2525_s21, 1  ;;  %p2019_p3 = scmp.ge.s32.totalorder %s2446_s20, 1 }
   0x6   : > { %s2535_s25 = scalar_select %p130_p0, %s2442_s19, %s132_s24  }
   0x7   : > { %p2537_p4 = por %p143_p2, %p142_p1  ;;  %p196_p5 = scmp.lt.s32.totalorder %s2446_s20, 3 }
   0x9   : > { %p197_p6 = pnand %p2019_p3, %p196_p5 }
   0xb   : > { %200 = sbr.rel (%p197_p6) target bundleno = 706 (0x2c2), region = 40 }
  0x12   : > { %v2240_v0 = vld [vmem:[%s3858_s1] sm:$0xff]   ;;  %s2545_s29 = smul.u32 24, %s2525_s21  ;;  %v2241_v1 = vld [vmem:[%s3858_s1 + $0x8] sm:$0xff]   ;;  %vm306_vm0 = vcmask 261120   ;;  %s2480_s20 = smov 96   ;;  %vm1152_vm1 = vcmask 31744  }
  0x13   : > { %2092 = vmatprep.subr.bf16.mxu0 %v2240_v0  ;;  %v2242_v38 = vld [vmem:[%s3860_s3] sm:$0xff]   ;;  %v2243_v39 = vld [vmem:[%s3860_s3 + $0x8] sm:$0xff]   ;;  %s2481_s23 = smov 92   ;;  %vm1657_vm14 = vcmask 7168   ;;  %vm1682_vm15 = vcmask 15360   ;;  %s224_s28 = sand.u32 1, %s2438_s18  }
  0x14   : > { %p232_p7 = scmp.lt.s32.totalorder %s2545_s29, 24  ;;  %2093 = vmatpush3.bf16.msra.mxu0 %v2240_v0  ;;  %2120 = vmatprep.subr.bf16.mxu1 %v2242_v38  ;;  %v2602_v40 = vld [vmem:[%s3859_s2] ss:$0 sm:$0xff]  ;;  %s3081_s18 = smul.u32 192, %s224_s28 }
  0x15   : > { %2094 = vmatprep.subr.bf16.mxu0 %v2241_v1  ;;  %2121 = vmatpush3.bf16.msra.mxu1 %v2242_v38  ;;  %s1715_s6 = ssub.s32 (%p2537_p4), 25, %s2545_s29 }
  0x16   : > { %s233_s7 = scalar_select %p232_p7, %s2545_s29, 24  ;;  %2122 = vmatprep.subr.bf16.mxu1 %v2243_v39 }
  0x17   : > { %s3142_s30 = scalar_lea.vmem [#allocation2], %s3081_s18   ;;  %p1716_p8 = scmp.lt.s32.totalorder (%p2537_p4), %s1715_s6, 24 }
  0x18   : > { %s2020_s8 = sshll.u32 %s233_s7, 3  ;;  %2095 = vmatpush3.bf16.msra.mxu0 %v2241_v1  ;;  %s2063_s7 = smul.u32 (%p2537_p4), 192, %s2525_s21 }
  0x19   : > { %s2555_s11 = scalar_lea.vmem %s3857_s0, %s2020_s8  ;;  %2123 = vmatpush3.bf16.msra.mxu1 %v2243_v39 }
  0x1a   : > { %v247_v2 = vld [vmem:[%s2555_s11] sm:$0xff]  ;;  %v248_v3 = vld [vmem:[%s2555_s11 + $0x8] sm:$0xff]  ;;  %v249_v4 = vld [vmem:[%s2555_s11 + $0x10] sm:$0xff]  ;;  %s3749_s10 = scalar_lea.vmem (%p2537_p4), %s3862_s5, %s2063_s7  }
  0x1b   : > { %v271_v5 = vpack.c.bf16 %v248_v3, %v247_v2  ;;  %v250_v6 = vld [vmem:[%s2555_s11 + $0x18] sm:$0xff]  ;;  %v251_v7 = vld [vmem:[%s2555_s11 + $0x20] sm:$0xff]  ;;  %v252_v8 = vld [vmem:[%s2555_s11 + $0x28] sm:$0xff] }
  0x1c   : > { %v272_v9 = vpack.c.bf16 %v250_v6, %v249_v4  ;;  %v273_v10 = vpack.c.bf16 %v252_v8, %v251_v7  ;;  %v253_v11 = vld [vmem:[%s2555_s11 + $0x30] sm:$0xff]  ;;  %v254_v12 = vld [vmem:[%s2555_s11 + $0x38] sm:$0xff]  ;;  %v255_v13 = vld [vmem:[%s2555_s11 + $0x40] sm:$0xff] }
  0x1d   : > { %2096 = vmatprep.mubr.msk.bf16.mxu0 %vm306_vm0, %v271_v5  ;;  %v256_v14 = vld [vmem:[%s2555_s11 + $0x48] sm:$0xff]  ;;  %v274_v15 = vpack.c.bf16 %v254_v12, %v253_v11  ;;  %v257_v17 = vld [vmem:[%s2555_s11 + $0x50] sm:$0xff]  ;;  %v258_v18 = vld [vmem:[%s2555_s11 + $0x58] sm:$0xff] }
  0x1e   : > { %2097 = vmatmul.mubr.msk.bf16.vlgmr.msra.gmra.mrb[0].mxu0 %vm306_vm0, %v272_v9  ;;  %v275_v16 = vpack.c.bf16 %v256_v14, %v255_v13  ;;  %v259_v19 = vld [vmem:[%s2555_s11 + $0x60] sm:$0xff]  ;;  %v260_v20 = vld [vmem:[%s2555_s11 + $0x68] sm:$0xff]  ;;  %v276_v21 = vpack.c.bf16 %v258_v18, %v257_v17  ;;  %v261_v23 = vld [vmem:[%s2555_s11 + $0x70] sm:$0xff] }
  0x1f   : > { %2100 = vmatprep.mubr.msk.bf16.mxu0 %vm306_vm0, %v273_v10  ;;  %v277_v22 = vpack.c.bf16 %v260_v20, %v259_v19  ;;  %v262_v24 = vld [vmem:[%s2555_s11 + $0x78] sm:$0xff]  ;;  %v263_v25 = vld [vmem:[%s2555_s11 + $0x80] sm:$0xff]  ;;  %v264_v26 = vld [vmem:[%s2555_s11 + $0x88] sm:$0xff] }
  0x20   : > { %v278_v27 = vpack.c.bf16 %v262_v24, %v261_v23  ;;  %v279_v28 = vpack.c.bf16 %v264_v26, %v263_v25  ;;  %v265_v29 = vld [vmem:[%s2555_s11 + $0x90] sm:$0xff]  ;;  %v266_v30 = vld [vmem:[%s2555_s11 + $0x98] sm:$0xff]  ;;  %v267_v31 = vld [vmem:[%s2555_s11 + $0xa0] sm:$0xff] }
  0x21   : > { %v268_v32 = vld [vmem:[%s2555_s11 + $0xa8] sm:$0xff]  ;;  %v280_v33 = vpack.c.bf16 %v266_v30, %v265_v29  ;;  %v269_v35 = vld [vmem:[%s2555_s11 + $0xb0] sm:$0xff]  ;;  %v270_v36 = vld [vmem:[%s2555_s11 + $0xb8] sm:$0xff] }
  0x22   : > { %v281_v34 = vpack.c.bf16 %v268_v32, %v267_v31  ;;  %v282_v37 = vpack.c.bf16 %v270_v36, %v269_v35 }
  0x26   : > { %2101 = vmatmul.mubr.msk.bf16.gmra.mrb[4].mxu0 %vm306_vm0, %v274_v15 }
  0x27   : > { %2104 = vmatprep.mubr.msk.bf16.mxu0 %vm306_vm0, %v275_v16 }
  0x2e   : > { %2105 = vmatmul.mubr.msk.bf16.gmra.mrb[8].mxu0 %vm306_vm0, %v276_v21 }
  0x2f   : > { %2108 = vmatprep.mubr.msk.bf16.mxu0 %vm306_vm0, %v277_v22 }
  0x36   : > { %2109 = vmatmul.mubr.msk.bf16.gmra.mrb[12].mxu0 %vm306_vm0, %v278_v27 }
  0x37   : > { %2112 = vmatprep.mubr.msk.bf16.mxu0 %vm306_vm0, %v279_v28 }
  0x3e   : > { %2113 = vmatmul.mubr.msk.bf16.gmra.mrb[16].mxu0 %vm306_vm0, %v280_v33 }
  0x3f   : > { %2116 = vmatprep.mubr.msk.bf16.mxu0 %vm306_vm0, %v281_v34 }
  0x46   : > { %2117 = vmatmul.mubr.msk.bf16.gmra.mrb[20].mxu0 %vm306_vm0, %v282_v37 }
  0xf1   : > { %v2098_v41 = vpop.f32.mrb[0].mxu0 }
  0xf2   : > { %v386_v42 = vadd.f32 %v2098_v41, %v2602_v40  ;;  %v377_v43 = vpop.f32.mrb[1].mxu0 }
  0xf3   : > { %v378_v44 = vadd.f32 %v2602_v40, %v377_v43  ;;  %v2099_v45 = vpop.f32.mrb[2].mxu0 }
  0xf4   : > { %v474_v46 = vmul.f32 0.01, %v386_v42  ;;  %v389_v47 = vadd.f32 %v2099_v45, %v2602_v40  ;;  %1084 = vrot.lane.b32.xlu1 %v386_v42, %s2480_s20  ;;  %v380_v48 = vpop.f32.mrb[3].mxu0  ;;  %v1275_v60 = vmul.f32 %v386_v42, %v386_v42 }
  0xf5   : > { %v381_v49 = vadd.f32 %v2602_v40, %v380_v48  ;;  %1080 = vrot.lane.b32.xlu0 %v378_v44, %s2480_s20  ;;  %v472_v50 = vmul.f32 0.01, %v378_v44  ;;  %v1273_v0 = vmul.f32 %v378_v44, %v378_v44 }
  0xf6   : > { %v475_v51 = vmul.f32 0.01, %v389_v47  ;;  %v498_v53 = vmax.f32 %v386_v42, %v474_v46  ;;  %v1276_v12 = vmul.f32 %v389_v47, %v389_v47 }
  0xf7   : > { %v473_v52 = vmul.f32 0.01, %v381_v49  ;;  %v496_v56 = vmax.f32 %v378_v44, %v472_v50  ;;  %v1274_v9 = vmul.f32 %v381_v49, %v381_v49 }
  0xf8   : > { %v499_v54 = vmax.f32 %v389_v47, %v475_v51  ;;  %1086 = vrot.lane.b32.xlu1 %v389_v47, %s2480_s20 }
  0xf9   : > { %v2102_v55 = vpop.f32.mrb[4].mxu0  ;;  %1082 = vrot.lane.b32.xlu0 %v381_v49, %s2480_s20  ;;  %v497_v57 = vmax.f32 %v381_v49, %v473_v52 }
  0xfa   : > { %v402_v58 = vadd.f32 %v2102_v55, %v2602_v40  ;;  %v393_v59 = vpop.f32.mrb[5].mxu0  ;;  %v521_v61 = vpack.c.bf16 %v499_v54, %v498_v53 }
  0xfb   : > { %v2614_v62 = vadd.f32 %v2602_v40, %v393_v59  ;;  %v2103_v63 = vpop.f32.mrb[6].mxu0  ;;  %v520_v1 = vpack.c.bf16 %v497_v57, %v496_v56 }
  0xfc   : > { %v478_v2 = vmul.f32 0.01, %v402_v58  ;;  %v405_v3 = vadd.f32 %v2103_v63, %v2602_v40  ;;  %1325 = vrot.lane.b32.xlu1 %v1275_v60, %s2481_s23  ;;  %v396_v4 = vpop.f32.mrb[7].mxu0  ;;  %v1279_v29 = vmul.f32 %v402_v58, %v402_v58 }
  0xfd   : > { %v476_v5 = vmul.f32 0.01, %v2614_v62  ;;  %v397_v6 = vadd.f32 %v2602_v40, %v396_v4  ;;  %1321 = vrot.lane.b32.xlu0 %v1273_v0, %s2481_s23  ;;  %2124 = vmatprep.mubr.msk.bf16.mxu1 %vm306_vm0, %v520_v1  ;;  %v1277_v50 = vmul.f32 %v2614_v62, %v2614_v62 }
  0xfe   : > { %v502_v7 = vmax.f32 %v402_v58, %v478_v2  ;;  %v479_v8 = vmul.f32 0.01, %v405_v3  ;;  %2125 = vmatmul.mubr.msk.bf16.vlgmr.msra.gmra.mrb[0].mxu1 %vm306_vm0, %v521_v61  ;;  %v1280_v41 = vmul.f32 %v405_v3, %v405_v3 }
  0xff   : > { %v500_v10 = vmax.f32 %v2614_v62, %v476_v5  ;;  %v477_v11 = vmul.f32 0.01, %v397_v6  ;;  %v1278_v53 = vmul.f32 %v397_v6, %v397_v6 }
 0x100   : > { %v503_v13 = vmax.f32 %v405_v3, %v479_v8  ;;  %1323 = vrot.lane.b32.xlu1 %v1274_v9, %s2481_s23 }
 0x101   : > { %v501_v14 = vmax.f32 %v397_v6, %v477_v11  ;;  %v2106_v15 = vpop.f32.mrb[8].mxu0  ;;  %1327 = vrot.lane.b32.xlu0 %v1276_v12, %s2481_s23 }
 0x102   : > { %v2627_v16 = vadd.f32 %v2106_v15, %v2602_v40  ;;  %v409_v17 = vpop.f32.mrb[9].mxu0  ;;  %v523_v18 = vpack.c.bf16 %v503_v13, %v502_v7 }
 0x103   : > { %v2630_v19 = vadd.f32 %v2602_v40, %v409_v17  ;;  %v2107_v20 = vpop.f32.mrb[10].mxu0  ;;  %v522_v21 = vpack.c.bf16 %v501_v14, %v500_v10 }
 0x104   : > { %v482_v22 = vmul.f32 0.01, %v2627_v16  ;;  %v2634_v23 = vadd.f32 %v2107_v20, %v2602_v40  ;;  %v412_v24 = vpop.f32.mrb[11].mxu0  ;;  %1094 = vrot.lane.b32.xlu1 %v405_v3, %s2480_s20 }
 0x105   : > { %v480_v25 = vmul.f32 0.01, %v2630_v19  ;;  %v2639_v26 = vadd.f32 %v2602_v40, %v412_v24  ;;  %1092 = vrot.lane.b32.xlu0 %v402_v58, %s2480_s20  ;;  %2128 = vmatprep.mubr.msk.bf16.mxu1 %vm306_vm0, %v522_v21 }
 0x106   : > { %v506_v27 = vmax.f32 %v2627_v16, %v482_v22  ;;  %v483_v28 = vmul.f32 0.01, %v2634_v23  ;;  %2129 = vmatmul.mubr.msk.bf16.gmra.mrb[4].mxu1 %vm306_vm0, %v523_v18  ;;  %v1284_v17 = vmul.f32 %v2634_v23, %v2634_v23 }
 0x107   : > { %v504_v30 = vmax.f32 %v2630_v19, %v480_v25  ;;  %v481_v31 = vmul.f32 0.01, %v2639_v26 }
 0x108   : > { %v507_v32 = vmax.f32 %v2634_v23, %v483_v28  ;;  %1333 = vrot.lane.b32.xlu1 %v1279_v29, %s2481_s23 }
 0x109   : > { %v505_v33 = vmax.f32 %v2639_v26, %v481_v31  ;;  %v2110_v34 = vpop.f32.mrb[12].mxu0  ;;  %1088 = vrot.lane.b32.xlu0 %v2614_v62, %s2480_s20  ;;  %v1282_v31 = vmul.f32 %v2639_v26, %v2639_v26 }
 0x10a   : > { %v2654_v35 = vadd.f32 %v2110_v34, %v2602_v40  ;;  %v425_v36 = vpop.f32.mrb[13].mxu0  ;;  %v525_v37 = vpack.c.bf16 %v507_v32, %v506_v27 }
 0x10b   : > { %v2657_v38 = vadd.f32 %v2602_v40, %v425_v36  ;;  %v2111_v39 = vpop.f32.mrb[14].mxu0  ;;  %v524_v42 = vpack.c.bf16 %v505_v33, %v504_v30 }
 0x10c   : > { %v486_v43 = vmul.f32 0.01, %v2654_v35  ;;  %v2661_v44 = vadd.f32 %v2111_v39, %v2602_v40  ;;  %v428_v45 = vpop.f32.mrb[15].mxu0  ;;  %1090 = vrot.lane.b32.xlu1 %v397_v6, %s2480_s20  ;;  %v1283_v6 = vmul.f32 %v2627_v16, %v2627_v16 }
 0x10d   : > { %v484_v46 = vmul.f32 0.01, %v2657_v38  ;;  %v2666_v47 = vadd.f32 %v2602_v40, %v428_v45  ;;  %1335 = vrot.lane.b32.xlu0 %v1280_v41, %s2481_s23  ;;  %2132 = vmatprep.mubr.msk.bf16.mxu1 %vm306_vm0, %v524_v42  ;;  %v1285_v36 = vmul.f32 %v2657_v38, %v2657_v38 }
 0x10e   : > { %v510_v48 = vmax.f32 %v2654_v35, %v486_v43  ;;  %v487_v49 = vmul.f32 0.01, %v2661_v44  ;;  %2133 = vmatmul.mubr.msk.bf16.gmra.mrb[8].mxu1 %vm306_vm0, %v525_v37 }
 0x10f   : > { %v508_v51 = vmax.f32 %v2657_v38, %v484_v46  ;;  %v485_v52 = vmul.f32 0.01, %v2666_v47  ;;  %v1286_v37 = vmul.f32 %v2666_v47, %v2666_v47 }
 0x110   : > { %v511_v54 = vmax.f32 %v2661_v44, %v487_v49  ;;  %1329 = vrot.lane.b32.xlu1 %v1277_v50, %s2481_s23 }
 0x111   : > { %v509_v55 = vmax.f32 %v2666_v47, %v485_v52  ;;  %v2114_v56 = vpop.f32.mrb[16].mxu0  ;;  %1331 = vrot.lane.b32.xlu0 %v1278_v53, %s2481_s23 }
 0x112   : > { %v2682_v57 = vadd.f32 %v2114_v56, %v2602_v40  ;;  %v441_v58 = vpop.f32.mrb[17].mxu0  ;;  %v527_v59 = vpack.c.bf16 %v511_v54, %v510_v48 }
 0x113   : > { %v2685_v60 = vadd.f32 %v2602_v40, %v441_v58  ;;  %v2115_v61 = vpop.f32.mrb[18].mxu0  ;;  %v526_v62 = vpack.c.bf16 %v509_v55, %v508_v51 }
 0x114   : > { %v490_v63 = vmul.f32 0.01, %v2682_v57  ;;  %v2689_v0 = vadd.f32 %v2115_v61, %v2602_v40  ;;  %v444_v1 = vpop.f32.mrb[19].mxu0  ;;  %1102 = vrot.lane.b32.xlu1 %v2634_v23, %s2480_s20  ;;  %v1281_v23 = vmul.f32 %v2630_v19, %v2630_v19 }
 0x115   : > { %v488_v2 = vmul.f32 0.01, %v2685_v60  ;;  %v2695_v3 = vadd.f32 %v2602_v40, %v444_v1  ;;  %1100 = vrot.lane.b32.xlu0 %v2627_v16, %s2480_s20  ;;  %2136 = vmatprep.mubr.msk.bf16.mxu1 %vm306_vm0, %v526_v62  ;;  %v1289_v39 = vmul.f32 %v2685_v60, %v2685_v60 }
 0x116   : > { %v514_v4 = vmax.f32 %v2682_v57, %v490_v63  ;;  %v491_v5 = vmul.f32 0.01, %v2689_v0  ;;  %2137 = vmatmul.mubr.msk.bf16.gmra.mrb[12].mxu1 %vm306_vm0, %v527_v59 }
 0x117   : > { %v512_v7 = vmax.f32 %v2685_v60, %v488_v2  ;;  %v489_v8 = vmul.f32 0.01, %v2695_v3  ;;  %v1290_v41 = vmul.f32 %v2695_v3, %v2695_v3 }
 0x118   : > { %v515_v9 = vmax.f32 %v2689_v0, %v491_v5  ;;  %1341 = vrot.lane.b32.xlu1 %v1283_v6, %s2481_s23 }
 0x119   : > { %v513_v10 = vmax.f32 %v2695_v3, %v489_v8  ;;  %v2118_v11 = vpop.f32.mrb[20].mxu0  ;;  %1096 = vrot.lane.b32.xlu0 %v2630_v19, %s2480_s20  ;;  %v1287_v19 = vmul.f32 %v2654_v35, %v2654_v35 }
 0x11a   : > { %v466_v12 = vadd.f32 %v2118_v11, %v2602_v40  ;;  %v457_v13 = vpop.f32.mrb[21].mxu0  ;;  %v529_v14 = vpack.c.bf16 %v515_v9, %v514_v4 }
 0x11b   : > { %v458_v15 = vadd.f32 %v2602_v40, %v457_v13  ;;  %v2119_v16 = vpop.f32.mrb[22].mxu0  ;;  %v528_v18 = vpack.c.bf16 %v513_v10, %v512_v7 }
 0x11c   : > { %v494_v20 = vmul.f32 0.01, %v466_v12  ;;  %v469_v21 = vadd.f32 %v2119_v16, %v2602_v40  ;;  %v460_v22 = vpop.f32.mrb[23].mxu0  ;;  %1098 = vrot.lane.b32.xlu1 %v2639_v26, %s2480_s20  ;;  %v1288_v26 = vmul.f32 %v2661_v44, %v2661_v44  ;;  %v1295_v42 = vmul.f32 %v466_v12, %v466_v12 }
 0x11d   : > { %v492_v24 = vmul.f32 0.01, %v458_v15  ;;  %v461_v25 = vadd.f32 %v2602_v40, %v460_v22  ;;  %1343 = vrot.lane.b32.xlu0 %v1284_v17, %s2481_s23  ;;  %2140 = vmatprep.mubr.msk.bf16.mxu1 %vm306_vm0, %v528_v18 }
 0x11e   : > { %v518_v27 = vmax.f32 %v466_v12, %v494_v20  ;;  %v495_v28 = vmul.f32 0.01, %v469_v21  ;;  %2141 = vmatmul.mubr.msk.bf16.gmra.mrb[16].mxu1 %vm306_vm0, %v529_v14  ;;  %v1296_v43 = vmul.f32 %v469_v21, %v469_v21 }
 0x11f   : > { %v516_v29 = vmax.f32 %v458_v15, %v492_v24  ;;  %v493_v30 = vmul.f32 0.01, %v461_v25  ;;  %v1294_v45 = vmul.f32 %v461_v25, %v461_v25 }
 0x120   : > { %v519_v32 = vmax.f32 %v469_v21, %v495_v28  ;;  %1337 = vrot.lane.b32.xlu1 %v1281_v23, %s2481_s23 }
 0x121   : > { %v517_v40 = vmax.f32 %v461_v25, %v493_v30  ;;  %1339 = vrot.lane.b32.xlu0 %v1282_v31, %s2481_s23 }
 0x122   : > { %v531_v33 = vpack.c.bf16 %v519_v32, %v518_v27 }
 0x123   : > { %v530_v34 = vpack.c.bf16 %v517_v40, %v516_v29 }
 0x124   : > { %1110 = vrot.lane.b32.xlu1 %v2661_v44, %s2480_s20  ;;  %v1293_v44 = vmul.f32 %v458_v15, %v458_v15 }
 0x125   : > { %1108 = vrot.lane.b32.xlu0 %v2654_v35, %s2480_s20  ;;  %2144 = vmatprep.mubr.msk.bf16.mxu1 %vm306_vm0, %v530_v34  ;;  %v1291_v35 = vmul.f32 %v2682_v57, %v2682_v57 }
 0x126   : > { %2145 = vmatmul.mubr.msk.bf16.gmra.mrb[20].mxu1 %vm306_vm0, %v531_v33 }
 0x128   : > { %1349 = vrot.lane.b32.xlu1 %v1287_v19, %s2481_s23 }
 0x129   : > { %1104 = vrot.lane.b32.xlu0 %v2657_v38, %s2480_s20  ;;  %v1292_v38 = vmul.f32 %v2689_v0, %v2689_v0 }
 0x12c   : > { %1106 = vrot.lane.b32.xlu1 %v2666_v47, %s2480_s20 }
 0x12d   : > { %1351 = vrot.lane.b32.xlu0 %v1288_v26, %s2481_s23 }
 0x130   : > { %1345 = vrot.lane.b32.xlu1 %v1285_v36, %s2481_s23 }
 0x131   : > { %1347 = vrot.lane.b32.xlu0 %v1286_v37, %s2481_s23 }
 0x134   : > { %1118 = vrot.lane.b32.xlu1 %v2689_v0, %s2480_s20 }
 0x135   : > { %1116 = vrot.lane.b32.xlu0 %v2682_v57, %s2480_s20 }
 0x138   : > { %1357 = vrot.lane.b32.xlu1 %v1291_v35, %s2481_s23 }
 0x139   : > { %1112 = vrot.lane.b32.xlu0 %v2685_v60, %s2480_s20 }
 0x13c   : > { %1114 = vrot.lane.b32.xlu1 %v2695_v3, %s2480_s20 }
 0x13d   : > { %1359 = vrot.lane.b32.xlu0 %v1292_v38, %s2481_s23 }
 0x140   : > { %1353 = vrot.lane.b32.xlu1 %v1289_v39, %s2481_s23 }
 0x141   : > { %1355 = vrot.lane.b32.xlu0 %v1290_v41, %s2481_s23 }
 0x144   : > { %1126 = vrot.lane.b32.xlu1 %v469_v21, %s2480_s20 }
 0x145   : > { %1124 = vrot.lane.b32.xlu0 %v466_v12, %s2480_s20 }
 0x148   : > { %1365 = vrot.lane.b32.xlu1 %v1295_v42, %s2481_s23 }
 0x149   : > { %1120 = vrot.lane.b32.xlu0 %v458_v15, %s2480_s20 }
 0x14c   : > { %1122 = vrot.lane.b32.xlu1 %v461_v25, %s2480_s20 }
 0x14d   : > { %1367 = vrot.lane.b32.xlu0 %v1296_v43, %s2481_s23 }
 0x150   : > { %1361 = vrot.lane.b32.xlu1 %v1293_v44, %s2481_s23 }
 0x151   : > { %1363 = vrot.lane.b32.xlu0 %v1294_v45, %s2481_s23 }
 0x166   : > { %v1085_v46 = vpop.permute.xlu1 %1084 }
 0x167   : > { %v1081_v47 = vpop.permute.xlu0 %1080  ;;  %v1159_v52 = vsel %vm1152_vm1, %v1085_v46, 0.0 }
 0x168   : > { %v1153_v56 = vsel %vm1152_vm1, %v1081_v47, 0.0 }
 0x16a   : > { %v1087_v48 = vpop.permute.xlu1 %1086 }
 0x16b   : > { %v1083_v49 = vpop.permute.xlu0 %1082  ;;  %v1162_v60 = vsel %vm1152_vm1, %v1087_v48, 0.0 }
 0x16c   : > { %v1156_v59 = vsel %vm1152_vm1, %v1083_v49, 0.0 }
 0x16e   : > { %v1326_v50 = vpop.permute.xlu1 %1325 }
 0x16f   : > { %v1322_v51 = vpop.permute.xlu0 %1321  ;;  %v1399_v55 = vsel %vm1152_vm1, %v1326_v50, 0.0 }
 0x170   : > { %1160 = vadd.xlane.f32.xlu0 %v1159_v52  ;;  %v1393_v63 = vsel %vm1152_vm1, %v1322_v51, 0.0 }
 0x172   : > { %v1324_v53 = vpop.permute.xlu1 %1323 }
 0x173   : > { %v1328_v54 = vpop.permute.xlu0 %1327  ;;  %v1396_v7 = vsel %vm1152_vm1, %v1324_v53, 0.0 }
 0x174   : > { %1400 = vadd.xlane.f32.xlu1 %v1399_v55  ;;  %1154 = vadd.xlane.f32.xlu0 %v1153_v56  ;;  %v1402_v3 = vsel %vm1152_vm1, %v1328_v54, 0.0 }
 0x176   : > { %v1095_v57 = vpop.permute.xlu1 %1094 }
 0x177   : > { %v1093_v58 = vpop.permute.xlu0 %1092  ;;  %v1174_v11 = vsel %vm1152_vm1, %v1095_v57, 0.0 }
 0x178   : > { %1157 = vadd.xlane.f32.xlu1 %v1156_v59  ;;  %1163 = vadd.xlane.f32.xlu0 %v1162_v60  ;;  %v1171_v0 = vsel %vm1152_vm1, %v1093_v58, 0.0 }
 0x17a   : > { %v1334_v61 = vpop.permute.xlu1 %1333 }
 0x17b   : > { %v1089_v62 = vpop.permute.xlu0 %1088  ;;  %v1411_v8 = vsel %vm1152_vm1, %v1334_v61, 0.0 }
 0x17c   : > { %1394 = vadd.xlane.f32.xlu0 %v1393_v63  ;;  %1172 = vadd.xlane.f32.xlu1 %v1171_v0  ;;  %v1165_v4 = vsel %vm1152_vm1, %v1089_v62, 0.0 }
 0x17e   : > { %v1091_v1 = vpop.permute.xlu1 %1090 }
 0x17f   : > { %v1336_v2 = vpop.permute.xlu0 %1335  ;;  %v1168_v15 = vsel %vm1152_vm1, %v1091_v1, 0.0 }
 0x180   : > { %1403 = vadd.xlane.f32.xlu0 %v1402_v3  ;;  %1166 = vadd.xlane.f32.xlu1 %v1165_v4  ;;  %v1414_v20 = vsel %vm1152_vm1, %v1336_v2, 0.0 }
 0x182   : > { %v1330_v5 = vpop.permute.xlu1 %1329 }
 0x183   : > { %v1332_v6 = vpop.permute.xlu0 %1331  ;;  %v1405_v12 = vsel %vm1152_vm1, %v1330_v5, 0.0 }
 0x184   : > { %1397 = vadd.xlane.f32.xlu0 %v1396_v7  ;;  %1412 = vadd.xlane.f32.xlu1 %v1411_v8  ;;  %v1408_v25 = vsel %vm1152_vm1, %v1332_v6, 0.0 }
 0x186   : > { %v1103_v9 = vpop.permute.xlu1 %1102 }
 0x187   : > { %v1101_v10 = vpop.permute.xlu0 %1100  ;;  %v1186_v29 = vsel %vm1152_vm1, %v1103_v9, 0.0 }
 0x188   : > { %1175 = vadd.xlane.f32.xlu0 %v1174_v11  ;;  %1406 = vadd.xlane.f32.xlu1 %v1405_v12  ;;  %v1183_v16 = vsel %vm1152_vm1, %v1101_v10, 0.0  ;;  %v2827_v11 = vld [vmem:[%s3861_s4] ss:$0 sm:$0xff] }
 0x18a   : > { %v1342_v13 = vpop.permute.xlu1 %1341 }
 0x18b   : > { %v1097_v14 = vpop.permute.xlu0 %1096  ;;  %v1423_v27 = vsel %vm1152_vm1, %v1342_v13, 0.0 }
 0x18c   : > { %1169 = vadd.xlane.f32.xlu0 %v1168_v15  ;;  %1184 = vadd.xlane.f32.xlu1 %v1183_v16  ;;  %v1177_v21 = vsel %vm1152_vm1, %v1097_v14, 0.0 }
 0x18e   : > { %v1099_v17 = vpop.permute.xlu1 %1098 }
 0x18f   : > { %v1344_v18 = vpop.permute.xlu0 %1343  ;;  %v1180_v30 = vsel %vm1152_vm1, %v1099_v17, 0.0 }
 0x190   : > { %1415 = vadd.xlane.f32.xlu0 %v1414_v20  ;;  %1178 = vadd.xlane.f32.xlu1 %v1177_v21  ;;  %v1426_v33 = vsel %vm1152_vm1, %v1344_v18, 0.0 }
 0x192   : > { %v1338_v22 = vpop.permute.xlu1 %1337 }
 0x193   : > { %v1340_v24 = vpop.permute.xlu0 %1339  ;;  %v1417_v40 = vsel %vm1152_vm1, %v1338_v22, 0.0 }
 0x194   : > { %1409 = vadd.xlane.f32.xlu0 %v1408_v25  ;;  %1424 = vadd.xlane.f32.xlu1 %v1423_v27  ;;  %v1420_v26 = vsel %vm1152_vm1, %v1340_v24, 0.0 }
 0x196   : > { %v1111_v28 = vpop.permute.xlu1 %1110 }
 0x197   : > { %v1109_v23 = vpop.permute.xlu0 %1108  ;;  %v1198_v38 = vsel %vm1152_vm1, %v1111_v28, 0.0 }
 0x198   : > { %1187 = vadd.xlane.f32.xlu0 %v1186_v29  ;;  %1181 = vadd.xlane.f32.xlu1 %v1180_v30  ;;  %v1195_v36 = vsel %vm1152_vm1, %v1109_v23, 0.0 }
 0x19a   : > { %v1350_v31 = vpop.permute.xlu1 %1349 }
 0x19b   : > { %v1105_v32 = vpop.permute.xlu0 %1104  ;;  %v1435_v44 = vsel %vm1152_vm1, %v1350_v31, 0.0 }
 0x19c   : > { %1418 = vadd.xlane.f32.xlu1 %v1417_v40  ;;  %1427 = vadd.xlane.f32.xlu0 %v1426_v33  ;;  %v1189_v39 = vsel %vm1152_vm1, %v1105_v32, 0.0 }
 0x19e   : > { %v1107_v34 = vpop.permute.xlu1 %1106 }
 0x19f   : > { %v1352_v19 = vpop.permute.xlu0 %1351  ;;  %v1192_v43 = vsel %vm1152_vm1, %v1107_v34, 0.0 }
 0x1a0   : > { %1421 = vadd.xlane.f32.xlu0 %v1420_v26  ;;  %1196 = vadd.xlane.f32.xlu1 %v1195_v36  ;;  %v1438_v48 = vsel %vm1152_vm1, %v1352_v19, 0.0 }
 0x1a2   : > { %v1346_v37 = vpop.permute.xlu1 %1345 }
 0x1a3   : > { %v1348_v35 = vpop.permute.xlu0 %1347  ;;  %v1429_v47 = vsel %vm1152_vm1, %v1346_v37, 0.0 }
 0x1a4   : > { %1199 = vadd.xlane.f32.xlu0 %v1198_v38  ;;  %1190 = vadd.xlane.f32.xlu1 %v1189_v39  ;;  %v1432_v52 = vsel %vm1152_vm1, %v1348_v35, 0.0 }
 0x1a6   : > { %v1119_v41 = vpop.permute.xlu1 %1118 }
 0x1a7   : > { %v1117_v42 = vpop.permute.xlu0 %1116  ;;  %v1210_v9 = vsel %vm1152_vm1, %v1119_v41, 0.0 }
 0x1a8   : > { %1193 = vadd.xlane.f32.xlu0 %v1192_v43  ;;  %1436 = vadd.xlane.f32.xlu1 %v1435_v44  ;;  %v1207_v8 = vsel %vm1152_vm1, %v1117_v42, 0.0 }
 0x1aa   : > { %v1358_v45 = vpop.permute.xlu1 %1357 }
 0x1ab   : > { %v1113_v46 = vpop.permute.xlu0 %1112  ;;  %v1447_v51 = vsel %vm1152_vm1, %v1358_v45, 0.0 }
 0x1ac   : > { %1430 = vadd.xlane.f32.xlu1 %v1429_v47  ;;  %1439 = vadd.xlane.f32.xlu0 %v1438_v48  ;;  %v1201_v6 = vsel %vm1152_vm1, %v1113_v46, 0.0 }
 0x1ae   : > { %v1115_v49 = vpop.permute.xlu1 %1114 }
 0x1af   : > { %v1360_v50 = vpop.permute.xlu0 %1359  ;;  %v1204_v7 = vsel %vm1152_vm1, %v1115_v49, 0.0 }
 0x1b0   : > { %1448 = vadd.xlane.f32.xlu1 %v1447_v51  ;;  %1433 = vadd.xlane.f32.xlu0 %v1432_v52  ;;  %v1450_v56 = vsel %vm1152_vm1, %v1360_v50, 0.0 }
 0x1b2   : > { %v1354_v53 = vpop.permute.xlu1 %1353 }
 0x1b3   : > { %v1356_v54 = vpop.permute.xlu0 %1355  ;;  %v1441_v55 = vsel %vm1152_vm1, %v1354_v53, 0.0 }
 0x1b4   : > { %1442 = vadd.xlane.f32.xlu1 %v1441_v55  ;;  %1451 = vadd.xlane.f32.xlu0 %v1450_v56  ;;  %v1444_v59 = vsel %vm1152_vm1, %v1356_v54, 0.0 }
 0x1b6   : > { %v1127_v57 = vpop.permute.xlu1 %1126 }
 0x1b7   : > { %v1125_v58 = vpop.permute.xlu0 %1124  ;;  %v1222_v24 = vsel %vm1152_vm1, %v1127_v57, 0.0 }
 0x1b8   : > { %1445 = vadd.xlane.f32.xlu0 %v1444_v59  ;;  %v1219_v18 = vsel %vm1152_vm1, %v1125_v58, 0.0 }
 0x1ba   : > { %v1366_v60 = vpop.permute.xlu1 %1365 }
 0x1bb   : > { %v1121_v61 = vpop.permute.xlu0 %1120  ;;  %v1459_v62 = vsel %vm1152_vm1, %v1366_v60, 0.0 }
 0x1bc   : > { %1460 = vadd.xlane.f32.xlu1 %v1459_v62  ;;  %v1213_v10 = vsel %vm1152_vm1, %v1121_v61, 0.0 }
 0x1be   : > { %v1123_v63 = vpop.permute.xlu1 %1122 }
 0x1bf   : > { %v1368_v0 = vpop.permute.xlu0 %1367  ;;  %v1216_v12 = vsel %vm1152_vm1, %v1123_v63, 0.0 }
 0x1c0   : > { %v1462_v1 = vsel %vm1152_vm1, %v1368_v0, 0.0 }
 0x1c1   : > { %1463 = vadd.xlane.f32.xlu0 %v1462_v1 }
 0x1c2   : > { %v1362_v2 = vpop.permute.xlu1 %1361 }
 0x1c3   : > { %v1364_v3 = vpop.permute.xlu0 %1363  ;;  %v1453_v4 = vsel %vm1152_vm1, %v1362_v2, 0.0 }
 0x1c4   : > { %1454 = vadd.xlane.f32.xlu1 %v1453_v4  ;;  %v1456_v5 = vsel %vm1152_vm1, %v1364_v3, 0.0 }
 0x1c5   : > { %1457 = vadd.xlane.f32.xlu0 %v1456_v5 }
 0x1c8   : > { %1202 = vadd.xlane.f32.xlu1 %v1201_v6 }
 0x1c9   : > { %1205 = vadd.xlane.f32.xlu0 %v1204_v7 }
 0x1cc   : > { %1208 = vadd.xlane.f32.xlu1 %v1207_v8 }
 0x1cd   : > { %1211 = vadd.xlane.f32.xlu0 %v1210_v9 }
 0x1d0   : > { %1214 = vadd.xlane.f32.xlu1 %v1213_v10 }
 0x1d1   : > { %1217 = vadd.xlane.f32.xlu0 %v1216_v12  ;;  %v2126_v13 = vpop.f32.mrb[0].mxu1 }
 0x1d2   : > { %v2831_v14 = vadd.f32 %v2126_v13, %v2827_v11  ;;  %v625_v15 = vpop.f32.mrb[1].mxu1 }
 0x1d3   : > { %v2834_v16 = vadd.f32 %v2827_v11, %v625_v15  ;;  %v2127_v17 = vpop.f32.mrb[2].mxu1 }
 0x1d4   : > { %v746_v20 = vmin.f32 %v2831_v14, 20.0  ;;  %v2839_v21 = vadd.f32 %v2127_v17, %v2827_v11  ;;  %1220 = vadd.xlane.f32.xlu1 %v1219_v18  ;;  %v628_v22 = vpop.f32.mrb[3].mxu1  ;;  %vm722_vm3 = vcmp.gt.f32.partialorder %v2831_v14, 20.0 }
 0x1d5   : > { %v744_v25 = vmin.f32 %v2834_v16, 20.0  ;;  %1223 = vadd.xlane.f32.xlu0 %v1222_v24  ;;  %v2845_v29 = vadd.f32 %v2827_v11, %v628_v22  ;;  %vm720_vm5 = vcmp.gt.f32.partialorder %v2834_v16, 20.0 }
 0x1d6   : > { %v772_v27 = vmul.f32 1.442695, %v746_v20  ;;  %v747_v28 = vmin.f32 %v2839_v21, 20.0  ;;  %vm723_vm7 = vcmp.gt.f32.partialorder %v2839_v21, 20.0 }
 0x1d7   : > { %v768_v23 = vmul.f32 1.442695, %v744_v25  ;;  %v745_v33 = vmin.f32 %v2845_v29, 20.0  ;;  %vm721_vm10 = vcmp.gt.f32.partialorder %v2845_v29, 20.0 }
 0x1d8   : > { %2244 = vpow2.f32 %v772_v27  ;;  %v774_v30 = vmul.f32 1.442695, %v747_v28 }
 0x1d9   : > { %2246 = vpow2.f32 %v768_v23  ;;  %v2130_v31 = vpop.f32.mrb[4].mxu1  ;;  %v770_v38 = vmul.f32 1.442695, %v745_v33 }
 0x1da   : > { %v2848_v32 = vadd.f32 %v2130_v31, %v2827_v11  ;;  %v641_v40 = vpop.f32.mrb[5].mxu1  ;;  %2248 = vpow2.f32 %v774_v30 }
 0x1db   : > { %v2131_v34 = vpop.f32.mrb[6].mxu1  ;;  %v2853_v26 = vadd.f32 %v2827_v11, %v641_v40 }
 0x1dc   : > { %v750_v19 = vmin.f32 %v2848_v32, 20.0  ;;  %v644_v36 = vpop.f32.mrb[7].mxu1  ;;  %v2856_v37 = vadd.f32 %v2131_v34, %v2827_v11  ;;  %vm726_vm8 = vcmp.gt.f32.partialorder %v2848_v32, 20.0 }
 0x1dd   : > { %v748_v39 = vmin.f32 %v2853_v26, 20.0  ;;  %v2860_v41 = vadd.f32 %v2827_v11, %v644_v36  ;;  %vm724_vm11 = vcmp.gt.f32.partialorder %v2853_v26, 20.0 }
 0x1de   : > { %v780_v35 = vmul.f32 1.442695, %v750_v19  ;;  %v751_v42 = vmin.f32 %v2856_v37, 20.0 }
 0x1df   : > { %v776_v50 = vmul.f32 1.442695, %v748_v39  ;;  %v749_v51 = vmin.f32 %v2860_v41, 20.0 }
 0x1e0   : > { %2250 = vpow2.f32 %v780_v35  ;;  %v782_v55 = vmul.f32 1.442695, %v751_v42 }
 0x1e1   : > { %v2134_v43 = vpop.f32.mrb[8].mxu1  ;;  %2252 = vpow2.f32 %v770_v38  ;;  %v778_v61 = vmul.f32 1.442695, %v749_v51 }
 0x1e2   : > { %v2245_v44 = vpop.eup %2244  ;;  %v2864_v45 = vadd.f32 %v2134_v43, %v2827_v11  ;;  %v657_v46 = vpop.f32.mrb[9].mxu1 }
 0x1e3   : > { %v2866_v47 = vpop.eup %2246  ;;  %v2135_v48 = vpop.f32.mrb[10].mxu1  ;;  %v834_v49 = vadd.f32 1.0, %v2245_v44  ;;  %v2870_v52 = vadd.f32 %v2827_v11, %v657_v46  ;;  %v837_v60 = vmul.f32 -0.5, %v2245_v44  ;;  %v840_v6 = vand.u32 2147483647, %v2245_v44 }
 0x1e4   : > { %v660_v53 = vpop.f32.mrb[11].mxu1  ;;  %v816_v54 = vadd.f32 1.0, %v2866_v47  ;;  %v2873_v56 = vpop.eup %2248  ;;  %v754_v57 = vmin.f32 %v2864_v45, 20.0  ;;  %v2877_v58 = vadd.f32 %v2135_v48, %v2827_v11  ;;  %v819_v12 = vmul.f32 -0.5, %v2866_v47 }
 0x1e5   : > { %2254 = vlog2.f32 %v834_v49  ;;  %v2880_v59 = vadd.f32 %v2827_v11, %v660_v53  ;;  %v752_v62 = vmin.f32 %v2870_v52, 20.0  ;;  %v843_v0 = vadd.f32 1.0, %v2873_v56 }
 0x1e6   : > { %2256 = vlog2.f32 %v816_v54  ;;  %v788_v2 = vmul.f32 1.442695, %v754_v57  ;;  %v755_v3 = vmin.f32 %v2877_v58, 20.0  ;;  %v838_v10 = vadd.f32 1.0, %v837_v60 }
 0x1e7   : > { %2258 = vpow2.f32 %v776_v50  ;;  %v753_v7 = vmin.f32 %v2880_v59, 20.0  ;;  %v784_v13 = vmul.f32 1.442695, %v752_v62  ;;  %v822_v18 = vand.u32 2147483647, %v2866_v47 }
 0x1e8   : > { %2260 = vpow2.f32 %v782_v55  ;;  %v790_v27 = vmul.f32 1.442695, %v755_v3  ;;  %vm2907_vm2 = vcmp.lt.f32.partialorder %v840_v6, 0.0004427343  ;;  %v839_v40 = vmul.f32 %v2245_v44, %v838_v10 }
 0x1e9   : > { %v2138_v63 = vpop.f32.mrb[12].mxu1  ;;  %2262 = vpow2.f32 %v778_v61  ;;  %v786_v31 = vmul.f32 1.442695, %v753_v7  ;;  %v820_v33 = vadd.f32 1.0, %v819_v12  ;;  %vm2913_vm4 = vcmp.lt.f32.partialorder %v822_v18, 0.0004427343 }
 0x1ea   : > { %v2884_v1 = vpop.eup %2250  ;;  %v2888_v4 = vadd.f32 %v2138_v63, %v2827_v11  ;;  %v673_v5 = vpop.f32.mrb[13].mxu1  ;;  %2264 = vlog2.f32 %v843_v0  ;;  %v846_v35 = vmul.f32 -0.5, %v2873_v56  ;;  %v849_v38 = vand.u32 2147483647, %v2873_v56 }
 0x1eb   : > { %v2892_v8 = vadd.f32 %v2827_v11, %v673_v5  ;;  %v2139_v9 = vpop.f32.mrb[14].mxu1  ;;  %v2899_v20 = vpop.eup %2252  ;;  %v870_v25 = vadd.f32 1.0, %v2884_v1  ;;  %2266 = vpow2.f32 %v788_v2  ;;  %v873_v44 = vmul.f32 -0.5, %v2884_v1 }
 0x1ec   : > { %v2896_v15 = vadd.f32 %v2139_v9, %v2827_v11  ;;  %v676_v17 = vpop.f32.mrb[15].mxu1  ;;  %v758_v22 = vmin.f32 %v2888_v4, 20.0  ;;  %v825_v60 = vadd.f32 1.0, %v2899_v20  ;;  %v821_v0 = vmul.f32 %v2866_v47, %v820_v33 }
 0x1ed   : > { %v2903_v24 = vadd.f32 %v2827_v11, %v676_v17  ;;  %v756_v28 = vmin.f32 %v2892_v8, 20.0  ;;  %2268 = vlog2.f32 %v870_v25  ;;  %v847_v2 = vadd.f32 1.0, %v846_v35 }
 0x1ee   : > { %v759_v19 = vmin.f32 %v2896_v15, 20.0  ;;  %2270 = vpow2.f32 %v784_v13  ;;  %v796_v39 = vmul.f32 1.442695, %v758_v22  ;;  %v874_v6 = vadd.f32 1.0, %v873_v44 }
 0x1ef   : > { %v2255_v30 = vpop.eup %2254  ;;  %v757_v42 = vmin.f32 %v2903_v24, 20.0  ;;  %2272 = vpow2.f32 %v790_v27  ;;  %v792_v48 = vmul.f32 1.442695, %v756_v28  ;;  %vm2944_vm6 = vcmp.lt.f32.partialorder %v849_v38, 0.0004427343 }
 0x1f0   : > { %v2257_v34 = vpop.eup %2256  ;;  %v836_v51 = vmul.f32 0.6931472, %v2255_v30  ;;  %2274 = vpow2.f32 %v786_v31  ;;  %v798_v61 = vmul.f32 1.442695, %v759_v19  ;;  %v828_v12 = vmul.f32 -0.5, %v2899_v20 }
 0x1f1   : > { %v2142_v43 = vpop.f32.mrb[16].mxu1  ;;  %v2922_v46 = vpop.eup %2258  ;;  %v818_v57 = vmul.f32 0.6931472, %v2257_v34  ;;  %2276 = vpow2.f32 %v796_v39  ;;  %v794_v3 = vmul.f32 1.442695, %v757_v42  ;;  %v848_v25 = vmul.f32 %v2873_v56, %v847_v2 }
 0x1f2   : > { %v2925_v49 = vadd.f32 %v2142_v43, %v2827_v11  ;;  %v689_v50 = vpop.f32.mrb[17].mxu1  ;;  %v2927_v53 = vpop.eup %2260  ;;  %2278 = vpow2.f32 %v792_v48  ;;  %v842_v9 = vsel %vm2907_vm2, %v839_v40, %v836_v51  ;;  %v876_v27 = vand.u32 2147483647, %v2884_v1 }
 0x1f3   : > { %v2930_v54 = vadd.f32 %v2827_v11, %v689_v50  ;;  %v2143_v55 = vpop.f32.mrb[18].mxu1  ;;  %v2940_v7 = vpop.eup %2262  ;;  %v824_v18 = vsel %vm2913_vm4, %v821_v0, %v818_v57  ;;  %2280 = vlog2.f32 %v825_v60  ;;  %v852_v28 = vadd.f32 1.0, %v2922_v46 }
 0x1f4   : > { %v2934_v62 = vadd.f32 %v2143_v55, %v2827_v11  ;;  %v692_v63 = vpop.f32.mrb[19].mxu1  ;;  %v2265_v47 = vpop.eup %2264  ;;  %v762_v13 = vmin.f32 %v2925_v49, 20.0  ;;  %2282 = vpow2.f32 %v798_v61  ;;  %v1034_v40 = vsel %vm722_vm3, %v2831_v14, %v842_v9 }
 0x1f5   : > { %v2938_v5 = vadd.f32 %v2827_v11, %v692_v63  ;;  %v760_v17 = vmin.f32 %v2930_v54, 20.0  ;;  %v2953_v22 = vpop.eup %2266  ;;  %2284 = vpow2.f32 %v794_v3  ;;  %v875_v33 = vmul.f32 %v2884_v1, %v874_v6 }
 0x1f6   : > { %v763_v30 = vmin.f32 %v2934_v62, 20.0  ;;  %v1032_v36 = vsel %vm720_vm5, %v2834_v16, %v824_v18  ;;  %v845_v35 = vmul.f32 0.6931472, %v2265_v47  ;;  %v804_v39 = vmul.f32 1.442695, %v762_v13 }
 0x1f7   : > { %v2269_v23 = vpop.eup %2268  ;;  %v761_v34 = vmin.f32 %v2938_v5, 20.0  ;;  %v800_v42 = vmul.f32 1.442695, %v760_v17  ;;  %v829_v44 = vadd.f32 1.0, %v828_v12  ;;  %2286 = vlog2.f32 %v852_v28 }
 0x1f8   : > { %v2972_v38 = vpop.eup %2270  ;;  %v872_v57 = vmul.f32 0.6931472, %v2269_v23  ;;  %v806_v61 = vmul.f32 1.442695, %v763_v30  ;;  %v1251_v2 = vmul.f32 %v1034_v40, %v1034_v40  ;;  %v2988_v3 = vmul.f32 %v1032_v36, %v1032_v36 }
 0x1f9   : > { %v2146_v31 = vpop.f32.mrb[20].mxu1  ;;  %v2977_v48 = vpop.eup %2272  ;;  %v802_v6 = vmul.f32 1.442695, %v761_v34  ;;  %v851_v12 = vsel %vm2944_vm6, %v848_v25, %v845_v35  ;;  %v855_v47 = vmul.f32 -0.5, %v2922_v46  ;;  %2288 = vpow2.f32 %v804_v39 }
 0x1fa   : > { %v2966_v19 = vadd.f32 %v2146_v31, %v2827_v11  ;;  %v705_v56 = vpop.f32.mrb[21].mxu1  ;;  %v2983_v60 = vpop.eup %2274  ;;  %vm2997_vm9 = vcmp.lt.f32.partialorder %v876_v27, 0.0004427343  ;;  %2290 = vpow2.f32 %v800_v42  ;;  %v3006_v10 = vmul.f32 %v2899_v20, %v829_v44 }
 0x1fb   : > { %v2975_v43 = vadd.f32 %v2827_v11, %v705_v56  ;;  %v2147_v1 = vpop.f32.mrb[22].mxu1  ;;  %v2994_v13 = vpop.eup %2276  ;;  %v878_v23 = vsel %vm2997_vm9, %v875_v33, %v872_v57  ;;  %v831_v25 = vand.u32 2147483647, %v2899_v20  ;;  %2292 = vpow2.f32 %v806_v61 }
 0x1fc   : > { %v766_v50 = vmin.f32 %v2966_v19, 20.0  ;;  %v2981_v51 = vadd.f32 %v2147_v1, %v2827_v11  ;;  %v708_v55 = vpop.f32.mrb[23].mxu1  ;;  %v3001_v28 = vpop.eup %2278  ;;  %v1035_v34 = vsel %vm723_vm7, %v2839_v21, %v851_v12  ;;  %v879_v56 = vadd.f32 1.0, %v2927_v53 }
 0x1fd   : > { %3876 = vst [vmem:[#allocation3_spill] sm:$0xff] %v2975_v43  ;;  %v2986_v63 = vadd.f32 %v2827_v11, %v708_v55  ;;  %v1161_v0 = vpop.xlane.xlu0 %1160  ;;  %v764_v9 = vmin.f32 %v2975_v43, 20.0  ;;  %v2281_v30 = vpop.eup %2280  ;;  %2294 = vpow2.f32 %v802_v6  ;;  %v856_v20 = vadd.f32 1.0, %v855_v47 }
 0x1fe   : > { %v812_v17 = vmul.f32 1.442695, %v766_v50  ;;  %v767_v18 = vmin.f32 %v2981_v51, 20.0  ;;  %v3014_v36 = vpop.eup %2282  ;;  %v1038_v1 = vsel %vm726_vm8, %v2848_v32, %v878_v23  ;;  %v858_v44 = vand.u32 2147483647, %v2922_v46 }
 0x1ff   : > { %3877 = vst [vmem:[#allocation4_spill] sm:$0xff] %v2986_v63  ;;  %v765_v31 = vmin.f32 %v2986_v63, 20.0  ;;  %v808_v33 = vmul.f32 1.442695, %v764_v9  ;;  %v3019_v39 = vpop.eup %2284  ;;  %v1252_v50 = vmul.f32 %v1035_v34, %v1035_v34  ;;  %v827_v55 = vmul.f32 0.6931472, %v2281_v30 }
 0x200   : > { %2296 = vpow2.f32 %v812_v17  ;;  %v814_v42 = vmul.f32 1.442695, %v767_v18  ;;  %v882_v57 = vmul.f32 -0.5, %v2927_v53  ;;  %vm3031_vm12 = vcmp.lt.f32.partialorder %v831_v25, 0.0004427343 }
 0x201   : > { %v1401_v40 = vpop.xlane.xlu1 %1400  ;;  %v1155_v27 = vpop.xlane.xlu0 %1154  ;;  %v810_v61 = vmul.f32 1.442695, %v765_v31  ;;  %v3035_v17 = vmul.f32 %v1038_v1, %v1038_v1  ;;  %v857_v18 = vmul.f32 %v2922_v46, %v856_v20  ;;  %v906_v11 = vadd.f32 1.0, %v2953_v22 }
 0x202   : > { %v3016_v35 = vadd.f32 %v1401_v40, %v1251_v2  ;;  %v3029_v2 = vadd.f32 %v1161_v0, %v2831_v14  ;;  %v2287_v47 = vpop.eup %2286  ;;  %vm3039_vm13 = vcmp.lt.f32.partialorder %v858_v44, 0.0004427343  ;;  %v861_v0 = vadd.f32 1.0, %v2940_v7 }
 0x203   : > { %v854_v23 = vmul.f32 0.6931472, %v2287_v47  ;;  %v833_v25 = vsel %vm3031_vm12, %v3006_v10, %v827_v55  ;;  %v883_v30 = vadd.f32 1.0, %v882_v57  ;;  %v909_v46 = vmul.f32 -0.5, %v2953_v22  ;;  %v3048_v31 = vpop.eup %2288 }
 0x204   : > { %2298 = vrsqrt.f32 %v3016_v35  ;;  %vm1505_vm0 = vcmp.eq.f32.partialorder %v3016_v35, inf  ;;  %v3052_v40 = vadd.f32 %v1155_v27, %v2834_v16  ;;  %v3055_v20 = vpop.eup %2290  ;;  %vm1507_vm1 = vcmp.eq.f32.partialorder %v3016_v35, 0.0 }
 0x205   : > { %v1158_v6 = vpop.xlane.xlu1 %1157  ;;  %v1164_v9 = vpop.xlane.xlu0 %1163  ;;  %2300 = vlog2.f32 %v879_v56  ;;  %v1508_v16 = vand.u32 2147483648, %v3016_v35  ;;  %v1033_v27 = vsel %vm721_vm10, %v2845_v29, %v833_v25  ;;  %v912_v44 = vand.u32 2147483647, %v2953_v22 }
 0x206   : > { %2302 = vpow2.f32 %v808_v33  ;;  %v885_v33 = vand.u32 2147483647, %v2927_v53  ;;  %v3064_v1 = vpop.eup %2292  ;;  %v888_v55 = vadd.f32 1.0, %v2972_v38  ;;  %v864_v12 = vmul.f32 -0.5, %v2940_v7 }
 0x207   : > { %2304 = vpow2.f32 %v814_v42  ;;  %v860_v42 = vsel %vm3039_vm13, %v857_v18, %v854_v23  ;;  %v3072_v57 = vpop.eup %2294  ;;  %v3084_v18 = vadd.f32 %v1158_v6, %v2845_v29  ;;  %v1250_v29 = vmul.f32 %v1033_v27, %v1033_v27 }
 0x208   : > { %2306 = vlog2.f32 %v906_v11  ;;  %v1036_v14 = vsel %vm724_vm11, %v2853_v26, %v860_v42  ;;  %vm3089_vm2 = vcmp.lt.f32.partialorder %v885_v33, 0.0004427343  ;;  %v915_v6 = vadd.f32 1.0, %v2977_v48 }
 0x209   : > { %2308 = vpow2.f32 %v810_v61  ;;  %v1173_v34 = vpop.xlane.xlu1 %1172  ;;  %v1395_v56 = vpop.xlane.xlu0 %1394  ;;  %v910_v61 = vadd.f32 1.0, %v909_v46  ;;  %vm3104_vm3 = vcmp.lt.f32.partialorder %v912_v44, 0.0004427343  ;;  %v891_v43 = vmul.f32 -0.5, %v2972_v38 }
 0x20a   : > { %v3060_v10 = vadd.f32 %v1395_v56, %v2988_v3  ;;  %2310 = vlog2.f32 %v861_v0  ;;  %v3076_v3 = vmul.f32 %v2927_v53, %v883_v30  ;;  %v3079_v47 = vpop.eup %2296  ;;  %v867_v53 = vand.u32 2147483647, %v2940_v7 }
 0x20b   : > { %v3095_v30 = vadd.f32 %v1164_v9, %v2839_v21  ;;  %v3102_v42 = vadd.f32 %v1173_v34, %v2848_v32  ;;  %vm727_vm4 = vcmp.gt.f32.partialorder %v2856_v37, 20.0  ;;  %v3114_v9 = vmul.f32 %v2953_v22, %v910_v61 }
 0x20c   : > { %2312 = vrsqrt.f32 %v3060_v10  ;;  %v865_v27 = vadd.f32 1.0, %v864_v12  ;;  %vm1491_vm5 = vcmp.eq.f32.partialorder %v3060_v10, inf  ;;  %vm3122_vm6 = vcmp.lt.f32.partialorder %v867_v53, 0.0004427343 }
 0x20d   : > { %v1167_v11 = vpop.xlane.xlu1 %1166  ;;  %v1404_v23 = vpop.xlane.xlu0 %1403  ;;  %2314 = vlog2.f32 %v888_v55  ;;  %vm730_vm7 = vcmp.gt.f32.partialorder %v2864_v45, 20.0  ;;  %vm725_vm8 = vcmp.gt.f32.partialorder %v2860_v41, 20.0  ;;  %vm1493_vm9 = vcmp.eq.f32.partialorder %v3060_v10, 0.0 }
 0x20e   : > { %v2299_v25 = vpop.eup %2298  ;;  %v3097_v46 = vadd.f32 %v1404_v23, %v1252_v50  ;;  %v1253_v50 = vmul.f32 %v1036_v14, %v1036_v14 }
 0x20f   : > { %v2301_v56 = vpop.eup %2300  ;;  %v1504_v63 = vmul.f32 %v2299_v25, %v3016_v35 }
 0x210   : > { %v3109_v21 = vpop.eup %2302  ;;  %2316 = vrsqrt.f32 %v3097_v46  ;;  %vm1512_vm10 = vcmp.eq.f32.partialorder %v3097_v46, inf  ;;  %vm1514_vm11 = vcmp.eq.f32.partialorder %v3097_v46, 0.0 }
 0x211   : > { %3888 = vst [vmem:[#allocation5_spill] sm:$0xff] %v3109_v21  ;;  %v3116_v32 = vpop.eup %2304  ;;  %v1506_v34 = vsel %vm1505_vm0, %v3016_v35, %v1504_v63  ;;  %v1413_v44 = vpop.xlane.xlu1 %1412  ;;  %2318 = vlog2.f32 %v915_v6  ;;  %v881_v63 = vmul.f32 0.6931472, %v2301_v56  ;;  %v892_v6 = vadd.f32 1.0, %v891_v43 }
 0x212   : > { %v1398_v55 = vpop.xlane.xlu0 %1397  ;;  %v2307_v14 = vpop.eup %2306  ;;  %v1509_v22 = vsel %vm1507_vm1, %v1508_v16, %v1506_v34  ;;  %v3129_v61 = vadd.f32 %v1413_v44, %v3035_v17  ;;  %v894_v21 = vand.u32 2147483647, %v2972_v38  ;;  %v918_v35 = vmul.f32 -0.5, %v2977_v48 }
 0x213   : > { %v3131_v12 = vadd.f32 %v1398_v55, %v1250_v29  ;;  %v3135_v25 = vpop.eup %2308  ;;  %v1660_v53 = vsel %vm1657_vm14, %v3029_v2, %v1509_v22  ;;  %v1494_v17 = vand.u32 2147483648, %v3060_v10  ;;  %v908_v29 = vmul.f32 0.6931472, %v2307_v14 }
 0x214   : > { %3891 = vst [vmem:[#allocation6_spill] sm:$0xff] %v3135_v25  ;;  %v2311_v16 = vpop.eup %2310  ;;  %1685 = vst.msk [vmem:[%s3142_s30 + $0x10] sm:$0xff] %vm1682_vm15, %v1660_v53  ;;  %2320 = vrsqrt.f32 %v3129_v61  ;;  %v3150_v2 = vadd.f32 %v1167_v11, %v2853_v26  ;;  %v866_v34 = vmul.f32 %v2940_v7, %v865_v27  ;;  %v1515_v55 = vand.u32 2147483648, %v3097_v46 }
 0x215   : > { %2322 = vrsqrt.f32 %v3131_v12  ;;  %v1407_v43 = vpop.xlane.xlu1 %1406  ;;  %v887_v26 = vsel %vm3089_vm2, %v3076_v3, %v881_v63  ;;  %v863_v14 = vmul.f32 0.6931472, %v2311_v16  ;;  %v3164_v53 = vmul.f32 %v2972_v38, %v892_v6 }
 0x216   : > { %v1176_v56 = vpop.xlane.xlu0 %1175  ;;  %v2313_v44 = vpop.eup %2312  ;;  %v3157_v22 = vadd.f32 %v1407_v43, %v1253_v50  ;;  %vm3166_vm12 = vcmp.lt.f32.partialorder %v894_v21, 0.0004427343  ;;  %v919_v7 = vadd.f32 1.0, %v918_v35  ;;  %vm1533_vm13 = vcmp.eq.f32.partialorder %v3129_v61, inf }
 0x217   : > { %v1490_v11 = vmul.f32 %v2313_v44, %v3060_v10  ;;  %v914_v0 = vsel %vm3104_vm3, %v3114_v9, %v908_v29  ;;  %v921_v3 = vand.u32 2147483647, %v2977_v48  ;;  %v2315_v50 = vpop.eup %2314  ;;  %vm1535_vm0 = vcmp.eq.f32.partialorder %v3129_v61, 0.0 }
 0x218   : > { %2324 = vrsqrt.f32 %v3157_v22  ;;  %v1039_v63 = vsel %vm727_vm4, %v2856_v37, %v887_v26  ;;  %v869_v33 = vsel %vm3122_vm6, %v866_v34, %v863_v14  ;;  %v1536_v35 = vand.u32 2147483648, %v3129_v61 }
 0x219   : > { %v1492_v38 = vsel %vm1491_vm5, %v3060_v10, %v1490_v11  ;;  %v1185_v21 = vpop.xlane.xlu1 %1184  ;;  %vm1498_vm1 = vcmp.eq.f32.partialorder %v3131_v12, inf  ;;  %vm1500_vm2 = vcmp.eq.f32.partialorder %v3131_v12, 0.0  ;;  %vm728_vm3 = vcmp.gt.f32.partialorder %v2870_v52, 20.0 }
 0x21a   : > { %v3180_v27 = vpop.xlane.xlu0 %1169  ;;  %v2317_v9 = vpop.eup %2316  ;;  %v1495_v6 = vsel %vm1493_vm9, %v1494_v17, %v1492_v38  ;;  %v1042_v23 = vsel %vm730_vm7, %v2864_v45, %v914_v0  ;;  %v1037_v10 = vsel %vm725_vm8, %v2860_v41, %v869_v33  ;;  %v1501_v17 = vand.u32 2147483648, %v3131_v12 }
 0x21b   : > { %v2319_v16 = vpop.eup %2318  ;;  %v1658_v29 = vsel %vm1657_vm14, %v3052_v40, %v1495_v6  ;;  %v1511_v43 = vmul.f32 %v2317_v9, %v3097_v46  ;;  %v3206_v34 = vadd.f32 %v1176_v56, %v2856_v37  ;;  %v1256_v44 = vmul.f32 %v1039_v63, %v1039_v63 }
 0x21c   : > { %1683 = vst.msk [vmem:[%s3142_s30] sm:$0xff] %vm1682_vm15, %v1658_v29  ;;  %v890_v26 = vmul.f32 0.6931472, %v2315_v50  ;;  %vm731_vm4 = vcmp.gt.f32.partialorder %v2877_v58, 20.0  ;;  %vm1519_vm5 = vcmp.eq.f32.partialorder %v3157_v22, inf  ;;  %v897_v38 = vadd.f32 1.0, %v2983_v60 }
 0x21d   : > { %v1513_v40 = vsel %vm1512_vm10, %v3097_v46, %v1511_v43  ;;  %v1179_v11 = vpop.xlane.xlu1 %1178  ;;  %v917_v0 = vmul.f32 0.6931472, %v2319_v16  ;;  %v1259_v50 = vmul.f32 %v1042_v23, %v1042_v23  ;;  %v1254_v63 = vmul.f32 %v1037_v10, %v1037_v10 }
 0x21e   : > { %v1416_v14 = vpop.xlane.xlu0 %1415  ;;  %v2321_v33 = vpop.eup %2320  ;;  %v1516_v37 = vsel %vm1514_vm11, %v1515_v55, %v1513_v40  ;;  %v920_v43 = vmul.f32 %v2977_v48, %v919_v7  ;;  %2326 = vlog2.f32 %v897_v38  ;;  %v896_v46 = vsel %vm3166_vm12, %v3164_v53, %v890_v26 }
 0x21f   : > { %v3216_v56 = vadd.f32 %v1416_v14, %v1256_v44  ;;  %v2323_v9 = vpop.eup %2322  ;;  %v1661_v6 = vsel %vm1657_vm14, %v3095_v30, %v1516_v37  ;;  %v1532_v29 = vmul.f32 %v2321_v33, %v3129_v61  ;;  %vm3229_vm6 = vcmp.lt.f32.partialorder %v921_v3, 0.0004427343 }
 0x220   : > { %1686 = vst.msk [vmem:[%s3142_s30 + $0x18] sm:$0xff] %vm1682_vm15, %v1661_v6  ;;  %v1497_v16 = vmul.f32 %v2323_v9, %v3131_v12  ;;  %vm1521_vm7 = vcmp.eq.f32.partialorder %v3157_v22, 0.0  ;;  %v1522_v30 = vand.u32 2147483648, %v3157_v22  ;;  %v923_v25 = vsel %vm3229_vm6, %v920_v43, %v917_v0 }
 0x221   : > { %2328 = vrsqrt.f32 %v3216_v56  ;;  %v1534_v48 = vsel %vm1533_vm13, %v3129_v61, %v1532_v29  ;;  %v1425_v7 = vpop.xlane.xlu1 %1424  ;;  %v1040_v61 = vsel %vm728_vm3, %v2870_v52, %v896_v46  ;;  %v3262_v38 = vadd.f32 %v1185_v21, %v2864_v45 }
 0x222   : > { %v1410_v23 = vpop.xlane.xlu0 %1409  ;;  %v2325_v53 = vpop.eup %2324  ;;  %v1537_v3 = vsel %vm1535_vm0, %v1536_v35, %v1534_v48  ;;  %v1499_v10 = vsel %vm1498_vm1, %v3131_v12, %v1497_v16  ;;  %v3245_v44 = vadd.f32 %v1425_v7, %v1259_v50  ;;  %v1043_v21 = vsel %vm731_vm4, %v2877_v58, %v923_v25 }
 0x223   : > { %v3247_v26 = vadd.f32 %v1410_v23, %v1254_v63  ;;  %v1664_v40 = vsel %vm1657_vm14, %v3102_v42, %v1537_v3  ;;  %v1502_v14 = vsel %vm1500_vm2, %v1501_v17, %v1499_v10  ;;  %v1518_v0 = vmul.f32 %v2325_v53, %v3157_v22 }
 0x224   : > { %1689 = vst.msk [vmem:[%s3142_s30 + $0x30] sm:$0xff] %vm1682_vm15, %v1664_v40  ;;  %v1659_v35 = vsel %vm1657_vm14, %v3084_v18, %v1502_v14  ;;  %2330 = vrsqrt.f32 %v3245_v44  ;;  %v900_v42 = vmul.f32 -0.5, %v2983_v60  ;;  %v3273_v17 = vadd.f32 %v3180_v27, %v2860_v41 }
 0x225   : > { %1684 = vst.msk [vmem:[%s3142_s30 + $0x8] sm:$0xff] %vm1682_vm15, %v1659_v35  ;;  %v1520_v12 = vsel %vm1519_vm5, %v3157_v22, %v1518_v0  ;;  %2332 = vrsqrt.f32 %v3247_v26  ;;  %v1182_v18 = vpop.xlane.xlu1 %1181  ;;  %v3282_v37 = vadd.f32 %v1179_v11, %v2870_v52  ;;  %v1257_v50 = vmul.f32 %v1040_v61, %v1040_v61 }
 0x226   : > { %v1188_v45 = vpop.xlane.xlu0 %1187  ;;  %v1523_v33 = vsel %vm1521_vm7, %v1522_v30, %v1520_v12  ;;  %vm729_vm8 = vcmp.gt.f32.partialorder %v2880_v59, 20.0  ;;  %vm1540_vm9 = vcmp.eq.f32.partialorder %v3216_v56, inf  ;;  %vm1542_vm10 = vcmp.eq.f32.partialorder %v3216_v56, 0.0 }
 0x227   : > { %v1662_v41 = vsel %vm1657_vm14, %v3150_v2, %v1523_v33  ;;  %v1543_v27 = vand.u32 2147483648, %v3216_v56  ;;  %vm1561_vm11 = vcmp.eq.f32.partialorder %v3245_v44, inf  ;;  %v1260_v22 = vmul.f32 %v1043_v21, %v1043_v21 }
 0x228   : > { %1687 = vst.msk [vmem:[%s3142_s30 + $0x20] sm:$0xff] %vm1682_vm15, %v1662_v41  ;;  %v901_v63 = vadd.f32 1.0, %v900_v42  ;;  %v942_v52 = vadd.f32 1.0, %v2994_v13  ;;  %v2327_v11 = vpop.eup %2326  ;;  %vm1563_vm12 = vcmp.eq.f32.partialorder %v3245_v44, 0.0  ;;  %v1564_v9 = vand.u32 2147483648, %v3245_v44 }
 0x229   : > { %vm1526_vm13 = vcmp.eq.f32.partialorder %v3247_v26, inf  ;;  %v1419_v2 = vpop.xlane.xlu1 %1418  ;;  %v903_v29 = vand.u32 2147483647, %v2983_v60  ;;  %v924_v43 = vadd.f32 1.0, %v3001_v28  ;;  %v899_v48 = vmul.f32 0.6931472, %v2327_v11 }
 0x22a   : > { %v1428_v6 = vpop.xlane.xlu0 %1427  ;;  %v3299_v46 = vadd.f32 %v1419_v2, %v1257_v50  ;;  %2334 = vlog2.f32 %v942_v52  ;;  %vm1528_vm0 = vcmp.eq.f32.partialorder %v3247_v26, 0.0  ;;  %v945_v7 = vmul.f32 -0.5, %v2994_v13 }
 0x22b   : > { %v2329_v16 = vpop.eup %2328  ;;  %v3301_v55 = vadd.f32 %v1428_v6, %v1260_v22  ;;  %2336 = vlog2.f32 %v924_v43  ;;  %v1529_v23 = vand.u32 2147483648, %v3247_v26  ;;  %v902_v25 = vmul.f32 %v2983_v60, %v901_v63 }
 0x22c   : > { %v1539_v30 = vmul.f32 %v2329_v16, %v3216_v56  ;;  %2338 = vrsqrt.f32 %v3299_v46  ;;  %v927_v53 = vmul.f32 -0.5, %v3001_v28  ;;  %v3314_v10 = vadd.f32 %v1182_v18, %v2880_v59 }
 0x22d   : > { %2340 = vrsqrt.f32 %v3301_v55  ;;  %v3317_v40 = vpop.xlane.xlu1 %1196  ;;  %vm904_vm1 = vcmp.lt.f32.partialorder %v903_v29, 0.0004427343  ;;  %v3322_v61 = vadd.f32 %v1188_v45, %v2877_v58  ;;  %v948_v42 = vand.u32 2147483647, %v2994_v13 }
 0x22e   : > { %v1541_v3 = vsel %vm1540_vm9, %v3216_v56, %v1539_v30  ;;  %v1422_v14 = vpop.xlane.xlu0 %1421  ;;  %v2331_v0 = vpop.eup %2330  ;;  %v905_v35 = vsel %vm904_vm1, %v902_v25, %v899_v48  ;;  %v946_v50 = vadd.f32 1.0, %v945_v7  ;;  %vm734_vm2 = vcmp.gt.f32.partialorder %v2888_v4, 20.0 }
 0x22f   : > { %v1544_v60 = vsel %vm1542_vm10, %v1543_v27, %v1541_v3  ;;  %v2333_v12 = vpop.eup %2332  ;;  %v1560_v21 = vmul.f32 %v2331_v0, %v3245_v44  ;;  %v1041_v33 = vsel %vm729_vm8, %v2880_v59, %v905_v35  ;;  %v928_v45 = vadd.f32 1.0, %v927_v53 }
 0x230   : > { %v1665_v18 = vsel %vm1657_vm14, %v3206_v34, %v1544_v60  ;;  %v1525_v56 = vmul.f32 %v2333_v12, %v3247_v26  ;;  %v1258_v58 = vmul.f32 %v1041_v33, %v1041_v33  ;;  %vm732_vm3 = vcmp.gt.f32.partialorder %v2892_v8, 20.0 }
 0x231   : > { %1690 = vst.msk [vmem:[%s3142_s30 + $0x38] sm:$0xff] %vm1682_vm15, %v1665_v18  ;;  %v1562_v34 = vsel %vm1561_vm11, %v3245_v44, %v1560_v21  ;;  %v1191_v41 = vpop.xlane.xlu1 %1190  ;;  %v930_v59 = vand.u32 2147483647, %v3001_v28  ;;  %v951_v22 = vadd.f32 1.0, %v3014_v36  ;;  %vm3348_vm4 = vcmp.lt.f32.partialorder %v948_v42, 0.0004427343 }
 0x232   : > { %v1200_v27 = vpop.xlane.xlu0 %1199  ;;  %v1565_v63 = vsel %vm1563_vm12, %v1564_v9, %v1562_v34  ;;  %v1527_v52 = vsel %vm1526_vm13, %v3247_v26, %v1525_v56  ;;  %v3346_v11 = vadd.f32 %v1422_v14, %v1258_v58  ;;  %vm1547_vm5 = vcmp.eq.f32.partialorder %v3299_v46, inf }
 0x233   : > { %v1668_v6 = vsel %vm1657_vm14, %v3262_v38, %v1565_v63  ;;  %v1530_v29 = vsel %vm1528_vm0, %v1529_v23, %v1527_v52  ;;  %v947_v44 = vmul.f32 %v2994_v13, %v946_v50  ;;  %v929_v16 = vmul.f32 %v3001_v28, %v928_v45 }
 0x234   : > { %v2335_v9 = vpop.eup %2334  ;;  %1693 = vst.msk [vmem:[%s3142_s30 + $0x50] sm:$0xff] %vm1682_vm15, %v1668_v6  ;;  %v1663_v43 = vsel %vm1657_vm14, %v3273_v17, %v1530_v29  ;;  %2342 = vrsqrt.f32 %v3346_v11  ;;  %v954_v48 = vmul.f32 -0.5, %v3014_v36  ;;  %vm1549_vm6 = vcmp.eq.f32.partialorder %v3299_v46, 0.0 }
 0x235   : > { %v2337_v38 = vpop.eup %2336  ;;  %1688 = vst.msk [vmem:[%s3142_s30 + $0x28] sm:$0xff] %vm1682_vm15, %v1663_v43  ;;  %v1437_v26 = vpop.xlane.xlu1 %1436  ;;  %v944_v30 = vmul.f32 0.6931472, %v2335_v9  ;;  %vm3368_vm7 = vcmp.lt.f32.partialorder %v930_v59, 0.0004427343  ;;  %2344 = vlog2.f32 %v951_v22  ;;  %v1550_v23 = vand.u32 2147483648, %v3299_v46 }
 0x236   : > { %v1194_v13 = vpop.xlane.xlu0 %1193  ;;  %v2339_v17 = vpop.eup %2338  ;;  %vm1568_vm8 = vcmp.eq.f32.partialorder %v3301_v55, inf  ;;  %vm1570_vm9 = vcmp.eq.f32.partialorder %v3301_v55, 0.0  ;;  %v926_v28 = vmul.f32 0.6931472, %v2337_v38  ;;  %v1571_v3 = vand.u32 2147483648, %v3301_v55 }
 0x237   : > { %v2341_v25 = vpop.eup %2340  ;;  %v1546_v53 = vmul.f32 %v2339_v17, %v3299_v46  ;;  %v950_v14 = vsel %vm3348_vm4, %v947_v44, %v944_v30  ;;  %v978_v0 = vadd.f32 1.0, %v3048_v31  ;;  %v955_v12 = vadd.f32 1.0, %v954_v48 }
 0x238   : > { %v1567_v60 = vmul.f32 %v2341_v25, %v3301_v55  ;;  %v1046_v35 = vsel %vm734_vm2, %v2888_v4, %v950_v14  ;;  %v932_v42 = vsel %vm3368_vm7, %v929_v16, %v926_v28  ;;  %v957_v56 = vand.u32 2147483647, %v3014_v36 }
 0x239   : > { %v1548_v18 = vsel %vm1547_vm5, %v3299_v46, %v1546_v53  ;;  %v1263_v21 = vmul.f32 %v1046_v35, %v1046_v35  ;;  %v1431_v33 = vpop.xlane.xlu1 %1430  ;;  %v1044_v50 = vsel %vm732_vm3, %v2892_v8, %v932_v42  ;;  %2346 = vlog2.f32 %v978_v0 }
 0x23a   : > { %v1551_v58 = vsel %vm1549_vm6, %v1550_v23, %v1548_v18  ;;  %v1569_v45 = vsel %vm1568_vm8, %v3301_v55, %v1567_v60  ;;  %v1261_v34 = vmul.f32 %v1044_v50, %v1044_v50  ;;  %v1440_v59 = vpop.xlane.xlu0 %1439  ;;  %v981_v2 = vmul.f32 -0.5, %v3048_v31 }
 0x23b   : > { %v1666_v22 = vsel %vm1657_vm14, %v3282_v37, %v1551_v58  ;;  %v1572_v63 = vsel %vm1570_vm9, %v1571_v3, %v1569_v45  ;;  %v3402_v52 = vadd.f32 %v1437_v26, %v1263_v21  ;;  %v3411_v6 = vadd.f32 %v3317_v40, %v2888_v4 }
 0x23c   : > { %1691 = vst.msk [vmem:[%s3142_s30 + $0x40] sm:$0xff] %vm1682_vm15, %v1666_v22  ;;  %v1669_v46 = vsel %vm1657_vm14, %v3322_v61, %v1572_v63  ;;  %v3413_v29 = vadd.f32 %v1431_v33, %v1261_v34  ;;  %vm735_vm10 = vcmp.gt.f32.partialorder %v2896_v15, 20.0  ;;  %vm1554_vm11 = vcmp.eq.f32.partialorder %v3346_v11, inf }
 0x23d   : > { %1694 = vst.msk [vmem:[%s3142_s30 + $0x58] sm:$0xff] %vm1682_vm15, %v1669_v46  ;;  %v3420_v37 = vadd.f32 %v1191_v41, %v2892_v8  ;;  %v3423_v55 = vadd.f32 %v1200_v27, %v2896_v15  ;;  %2348 = vrsqrt.f32 %v3402_v52  ;;  %vm1556_vm12 = vcmp.eq.f32.partialorder %v3346_v11, 0.0  ;;  %v1449_v35 = vpop.xlane.xlu1 %1448 }
 0x23e   : > { %v2343_v61 = vpop.eup %2342  ;;  %v1557_v4 = vand.u32 2147483648, %v3346_v11  ;;  %2350 = vrsqrt.f32 %v3413_v29  ;;  %v956_v40 = vmul.f32 %v3014_v36, %v955_v12  ;;  %vm3431_vm13 = vcmp.lt.f32.partialorder %v957_v56, 0.0004427343  ;;  %v3441_v36 = vpop.xlane.xlu0 %1433 }
 0x23f   : > { %v2345_v44 = vpop.eup %2344  ;;  %v1553_v9 = vmul.f32 %v2343_v61, %v3346_v11  ;;  %v982_v41 = vadd.f32 1.0, %v981_v2  ;;  %v933_v27 = vadd.f32 1.0, %v3019_v39  ;;  %v3437_v43 = vadd.f32 %v1194_v13, %v2903_v24 }
 0x240   : > { %v953_v16 = vmul.f32 0.6931472, %v2345_v44  ;;  %vm738_vm0 = vcmp.gt.f32.partialorder %v2925_v49, 20.0  ;;  %v984_v48 = vand.u32 2147483647, %v3048_v31  ;;  %v936_v26 = vmul.f32 -0.5, %v3019_v39 }
 0x241   : > { %v1555_v38 = vsel %vm1554_vm11, %v3346_v11, %v1553_v9  ;;  %2352 = vlog2.f32 %v933_v27  ;;  %v960_v30 = vadd.f32 1.0, %v3055_v20  ;;  %vm1589_vm1 = vcmp.eq.f32.partialorder %v3402_v52, inf }
 0x242   : > { %v1558_v13 = vsel %vm1556_vm12, %v1557_v4, %v1555_v38  ;;  %v959_v7 = vsel %vm3431_vm13, %v956_v40, %v953_v16  ;;  %v983_v17 = vmul.f32 %v3048_v31, %v982_v41  ;;  %v963_v25 = vmul.f32 -0.5, %v3055_v20  ;;  %v3476_v12 = vpop.xlane.xlu0 %1451 }
 0x243   : > { %v1667_v23 = vsel %vm1657_vm14, %v3314_v10, %v1558_v13  ;;  %v1047_v28 = vsel %vm735_vm10, %v2896_v15, %v959_v7  ;;  %2354 = vlog2.f32 %v960_v30  ;;  %v2347_v53 = vpop.eup %2346  ;;  %vm1591_vm2 = vcmp.eq.f32.partialorder %v3402_v52, 0.0 }
 0x244   : > { %1692 = vst.msk [vmem:[%s3142_s30 + $0x48] sm:$0xff] %vm1682_vm15, %v1667_v23  ;;  %v1592_v11 = vand.u32 2147483648, %v3402_v52  ;;  %v1264_v3 = vmul.f32 %v1047_v28, %v1047_v28  ;;  %vm3464_vm3 = vcmp.lt.f32.partialorder %v984_v48, 0.0004427343  ;;  %v980_v10 = vmul.f32 0.6931472, %v2347_v53 }
 0x245   : > { %v937_v14 = vadd.f32 1.0, %v936_v26  ;;  %v939_v0 = vand.u32 2147483647, %v3019_v39  ;;  %v987_v15 = vadd.f32 1.0, %v3064_v1  ;;  %vm1575_vm4 = vcmp.eq.f32.partialorder %v3413_v29, inf }
 0x246   : > { %vm1577_vm5 = vcmp.eq.f32.partialorder %v3413_v29, 0.0  ;;  %v3472_v60 = vadd.f32 %v1440_v59, %v1264_v3  ;;  %vm733_vm6 = vcmp.gt.f32.partialorder %v2903_v24, 20.0  ;;  %v966_v42 = vand.u32 2147483647, %v3055_v20  ;;  %v3514_v38 = vpop.xlane.xlu0 %1445 }
 0x247   : > { %v2349_v18 = vpop.eup %2348  ;;  %v986_v21 = vsel %vm3464_vm3, %v983_v17, %v980_v10  ;;  %v964_v33 = vadd.f32 1.0, %v963_v25  ;;  %2356 = vlog2.f32 %v987_v15  ;;  %v990_v50 = vmul.f32 -0.5, %v3064_v1 }
 0x248   : > { %v2351_v56 = vpop.eup %2350  ;;  %v1588_v58 = vmul.f32 %v2349_v18, %v3402_v52  ;;  %v1578_v45 = vand.u32 2147483648, %v3413_v29  ;;  %2358 = vrsqrt.f32 %v3472_v60  ;;  %vm736_vm7 = vcmp.gt.f32.partialorder %v2930_v54, 20.0 }
 0x249   : > { %v1574_v34 = vmul.f32 %v2351_v56, %v3413_v29  ;;  %v1050_v59 = vsel %vm738_vm0, %v2925_v49, %v986_v21  ;;  %v938_v22 = vmul.f32 %v3019_v39, %v937_v14  ;;  %vm3490_vm8 = vcmp.lt.f32.partialorder %v939_v0, 0.0004427343 }
 0x24a   : > { %v1590_v2 = vsel %vm1589_vm1, %v3402_v52, %v1588_v58  ;;  %vm3497_vm9 = vcmp.lt.f32.partialorder %v966_v42, 0.0004427343  ;;  %v993_v61 = vand.u32 2147483647, %v3064_v1  ;;  %v969_v4 = vadd.f32 1.0, %v3072_v57  ;;  %v1443_v52 = vpop.xlane.xlu1 %1442 }
 0x24b   : > { %v2353_v40 = vpop.eup %2352  ;;  %v1593_v39 = vsel %vm1591_vm2, %v1592_v11, %v1590_v2  ;;  %v1576_v44 = vsel %vm1575_vm4, %v3413_v29, %v1574_v34  ;;  %v965_v9 = vmul.f32 %v3055_v20, %v964_v33  ;;  %v991_v8 = vadd.f32 1.0, %v990_v50 }
 0x24c   : > { %v1672_v41 = vsel %vm1657_vm14, %v3411_v6, %v1593_v39  ;;  %v1579_v27 = vsel %vm1577_vm5, %v1578_v45, %v1576_v44  ;;  %vm1596_vm10 = vcmp.eq.f32.partialorder %v3472_v60, inf  ;;  %v1267_v16 = vmul.f32 %v1050_v59, %v1050_v59 }
 0x24d   : > { %v935_v48 = vmul.f32 0.6931472, %v2353_v40  ;;  %v2355_v26 = vpop.eup %2354  ;;  %1697 = vst.msk [vmem:[%s3142_s30 + $0x70] sm:$0xff] %vm1682_vm15, %v1672_v41  ;;  %v1670_v20 = vsel %vm1657_vm14, %v3420_v37, %v1579_v27  ;;  %vm1598_vm11 = vcmp.eq.f32.partialorder %v3472_v60, 0.0  ;;  %vm739_vm12 = vcmp.gt.f32.partialorder %v2934_v62, 20.0 }
 0x24e   : > { %2360 = vlog2.f32 %v969_v4  ;;  %v972_v6 = vmul.f32 -0.5, %v3072_v57  ;;  %1695 = vst.msk [vmem:[%s3142_s30 + $0x60] sm:$0xff] %vm1682_vm15, %v1670_v20  ;;  %v1599_v29 = vand.u32 2147483648, %v3472_v60  ;;  %v3526_v30 = vadd.f32 %v1449_v35, %v1267_v16  ;;  %v3543_v31 = vpop.xlane.xlu1 %1460  ;;  %v3545_v10 = vpop.xlane.xlu0 %1463 }
 0x24f   : > { %v941_v13 = vsel %vm3490_vm8, %v938_v22, %v935_v48  ;;  %v962_v7 = vmul.f32 0.6931472, %v2355_v26  ;;  %v992_v17 = vmul.f32 %v3064_v1, %v991_v8  ;;  %v1014_v23 = vadd.f32 1.0, %v3079_v47 }
 0x250   : > { %v1045_v37 = vsel %vm733_vm6, %v2903_v24, %v941_v13  ;;  %v1017_v28 = vmul.f32 -0.5, %v3079_v47  ;;  %vm3538_vm13 = vcmp.lt.f32.partialorder %v993_v61, 0.0004427343  ;;  %v975_v3 = vand.u32 2147483647, %v3072_v57 }
 0x251   : > { %v1262_v25 = vmul.f32 %v1045_v37, %v1045_v37  ;;  %v968_v53 = vsel %vm3497_vm9, %v965_v9, %v962_v7  ;;  %v2357_v24 = vpop.eup %2356  ;;  %v973_v14 = vadd.f32 1.0, %v972_v6  ;;  %2362 = vlog2.f32 %v1014_v23  ;;  %v3914_v9 = vld [vmem:[#allocation5_spill] sm:$0xff] }
 0x252   : > { %v1048_v1 = vsel %vm736_vm7, %v2930_v54, %v968_v53  ;;  %v1023_v0 = vadd.f32 1.0, %v3116_v32  ;;  %v2359_v15 = vpop.eup %2358  ;;  %2364 = vrsqrt.f32 %v3526_v30  ;;  %v989_v42 = vmul.f32 0.6931472, %v2357_v24  ;;  %v3565_v58 = vpop.xlane.xlu1 %1454 }
 0x253   : > { %v3553_v35 = vadd.f32 %v3441_v36, %v1262_v25  ;;  %vm737_vm0 = vcmp.gt.f32.partialorder %v2938_v5, 20.0  ;;  %v1020_v18 = vand.u32 2147483647, %v3079_v47  ;;  %v1595_v21 = vmul.f32 %v2359_v15, %v3472_v60  ;;  %v3585_v61 = vpop.xlane.xlu0 %1457 }
 0x254   : > { %v1265_v33 = vmul.f32 %v1048_v1, %v1048_v1  ;;  %v1018_v50 = vadd.f32 1.0, %v1017_v28  ;;  %2366 = vlog2.f32 %v1023_v0  ;;  %vm3559_vm1 = vcmp.lt.f32.partialorder %v975_v3, 0.0004427343  ;;  %v3918_v3 = vld [vmem:[#allocation3_spill] sm:$0xff] }
 0x255   : > { %2368 = vrsqrt.f32 %v3553_v35  ;;  %vm742_vm2 = vcmp.gt.f32.partialorder %v2966_v19, 20.0  ;;  %v1026_v36 = vmul.f32 -0.5, %v3116_v32  ;;  %v1597_v45 = vsel %vm1596_vm10, %v3472_v60, %v1595_v21 }
 0x256   : > { %v3570_v34 = vadd.f32 %v1443_v52, %v1265_v33  ;;  %v995_v59 = vsel %vm3538_vm13, %v992_v17, %v989_v42  ;;  %v974_v22 = vmul.f32 %v3072_v57, %v973_v14  ;;  %v1600_v63 = vsel %vm1598_vm11, %v1599_v29, %v1597_v45  ;;  %v1203_v6 = vpop.xlane.xlu1 %1202  ;;  %v3921_v33 = vld [vmem:[#allocation4_spill] sm:$0xff] }
 0x257   : > { %v1051_v2 = vsel %vm739_vm12, %v2934_v62, %v995_v59  ;;  %vm3580_vm3 = vcmp.lt.f32.partialorder %v1020_v18, 0.0004427343  ;;  %vm743_vm4 = vcmp.gt.f32.partialorder %v2981_v51, 20.0  ;;  %v1673_v40 = vsel %vm1657_vm14, %v3423_v55, %v1600_v63  ;;  %v3613_v25 = vpop.xlane.xlu0 %1205 }
 0x258   : > { %v2361_v4 = vpop.eup %2360  ;;  %2370 = vrsqrt.f32 %v3570_v34  ;;  %v1268_v57 = vmul.f32 %v1051_v2, %v1051_v2  ;;  %v1019_v60 = vmul.f32 %v3079_v47, %v1018_v50  ;;  %1698 = vst.msk [vmem:[%s3142_s30 + $0x78] sm:$0xff] %vm1682_vm15, %v1673_v40  ;;  %vm1582_vm5 = vcmp.eq.f32.partialorder %v3553_v35, inf  ;;  %v3915_v47 = vld [vmem:[#allocation6_spill] sm:$0xff] }
 0x259   : > { %v971_v39 = vmul.f32 0.6931472, %v2361_v4  ;;  %v1027_v44 = vadd.f32 1.0, %v1026_v36  ;;  %v996_v8 = vadd.f32 1.0, %v3914_v9  ;;  %v999_v41 = vmul.f32 -0.5, %v3914_v9 }
 0x25a   : > { %vm1584_vm6 = vcmp.eq.f32.partialorder %v3553_v35, 0.0  ;;  %v3598_v27 = vadd.f32 %v3476_v12, %v1268_v57  ;;  %v1029_v55 = vand.u32 2147483647, %v3116_v32  ;;  %v1002_v16 = vand.u32 2147483647, %v3914_v9  ;;  %v1209_v45 = vpop.xlane.xlu1 %1208 }
 0x25b   : > { %v1005_v48 = vadd.f32 1.0, %v3915_v47  ;;  %v977_v52 = vsel %vm3559_vm1, %v974_v22, %v971_v39  ;;  %2372 = vlog2.f32 %v996_v8  ;;  %v1000_v26 = vadd.f32 1.0, %v999_v41  ;;  %v2363_v29 = vpop.eup %2362  ;;  %v1212_v57 = vpop.xlane.xlu0 %1211 }
 0x25c   : > { %v1008_v20 = vmul.f32 -0.5, %v3915_v47  ;;  %v1585_v13 = vand.u32 2147483648, %v3553_v35  ;;  %2374 = vrsqrt.f32 %v3598_v27  ;;  %v1049_v12 = vsel %vm737_vm0, %v2938_v5, %v977_v52  ;;  %v2365_v37 = vpop.eup %2364 }
 0x25d   : > { %v1011_v7 = vand.u32 2147483647, %v3915_v47  ;;  %v1266_v17 = vmul.f32 %v1049_v12, %v1049_v12  ;;  %v1016_v23 = vmul.f32 0.6931472, %v2363_v29  ;;  %v1028_v28 = vmul.f32 %v3116_v32, %v1027_v44 }
 0x25e   : > { %2376 = vlog2.f32 %v1005_v48  ;;  %v2367_v53 = vpop.eup %2366  ;;  %vm3615_vm7 = vcmp.lt.f32.partialorder %v1029_v55, 0.0004427343  ;;  %vm740_vm8 = vcmp.gt.f32.partialorder %v3918_v3, 20.0  ;;  %vm3620_vm9 = vcmp.lt.f32.partialorder %v1002_v16, 0.0004427343 }
 0x25f   : > { %v1009_v1 = vadd.f32 1.0, %v1008_v20  ;;  %v2369_v14 = vpop.eup %2368  ;;  %v3625_v0 = vadd.f32 %v3514_v38, %v1266_v17  ;;  %v1022_v32 = vsel %vm3580_vm3, %v1019_v60, %v1016_v23  ;;  %v1025_v15 = vmul.f32 0.6931472, %v2367_v53  ;;  %v1215_v20 = vpop.xlane.xlu1 %1214 }
 0x260   : > { %v1001_v42 = vmul.f32 %v3914_v9, %v1000_v26  ;;  %v1581_v18 = vmul.f32 %v2369_v14, %v3553_v35  ;;  %v1054_v21 = vsel %vm742_vm2, %v2966_v19, %v1022_v32  ;;  %vm741_vm10 = vcmp.gt.f32.partialorder %v3921_v33, 20.0 }
 0x261   : > { %vm3635_vm11 = vcmp.lt.f32.partialorder %v1011_v7, 0.0004427343  ;;  %v1241_v38 = vadd.f32 %v1203_v6, %v2930_v54  ;;  %2378 = vrsqrt.f32 %v3625_v0  ;;  %v1271_v56 = vmul.f32 %v1054_v21, %v1054_v21 }
 0x262   : > { %v1031_v36 = vsel %vm3615_vm7, %v1028_v28, %v1025_v15  ;;  %vm1603_vm12 = vcmp.eq.f32.partialorder %v3570_v34, inf  ;;  %v2371_v59 = vpop.eup %2370  ;;  %v1583_v22 = vsel %vm1582_vm5, %v3553_v35, %v1581_v18  ;;  %v1010_v54 = vmul.f32 %v3915_v47, %v1009_v1 }
 0x263   : > { %v1055_v63 = vsel %vm743_vm4, %v2981_v51, %v1031_v36  ;;  %vm1605_vm13 = vcmp.eq.f32.partialorder %v3570_v34, 0.0  ;;  %v1586_v2 = vsel %vm1584_vm6, %v1585_v13, %v1583_v22  ;;  %v3655_v46 = vadd.f32 %v3543_v31, %v1271_v56 }
 0x264   : > { %v1272_v4 = vmul.f32 %v1055_v63, %v1055_v63  ;;  %v1602_v40 = vmul.f32 %v2371_v59, %v3570_v34  ;;  %v1671_v60 = vsel %vm1657_vm14, %v3437_v43, %v1586_v2  ;;  %v1606_v39 = vand.u32 2147483648, %v3570_v34 }
 0x265   : > { %v1243_v44 = vadd.f32 %v1209_v45, %v2925_v49  ;;  %v1616_v9 = vmul.f32 %v2365_v37, %v3526_v30  ;;  %v2373_v8 = vpop.eup %2372  ;;  %1696 = vst.msk [vmem:[%s3142_s30 + $0x68] sm:$0xff] %vm1682_vm15, %v1671_v60  ;;  %2380 = vrsqrt.f32 %v3655_v46  ;;  %vm1617_vm0 = vcmp.eq.f32.partialorder %v3526_v30, inf }
 0x266   : > { %v3667_v31 = vadd.f32 %v3545_v10, %v1272_v4  ;;  %v1604_v35 = vsel %vm1603_vm12, %v3570_v34, %v1602_v40  ;;  %v2375_v43 = vpop.eup %2374  ;;  %v998_v41 = vmul.f32 0.6931472, %v2373_v8  ;;  %vm1619_vm1 = vcmp.eq.f32.partialorder %v3526_v30, 0.0 }
 0x267   : > { %v1607_v49 = vsel %vm1605_vm13, %v1606_v39, %v1604_v35  ;;  %v1618_v55 = vsel %vm1617_vm0, %v3526_v30, %v1616_v9  ;;  %v1620_v47 = vand.u32 2147483648, %v3526_v30  ;;  %v1244_v48 = vadd.f32 %v1212_v57, %v2934_v62  ;;  %v1218_v30 = vpop.xlane.xlu0 %1217 }
 0x268   : > { %v2377_v16 = vpop.eup %2376  ;;  %2382 = vrsqrt.f32 %v3667_v31  ;;  %v1674_v10 = vsel %vm1657_vm14, %v1241_v38, %v1607_v49  ;;  %v1004_v52 = vsel %vm3620_vm9, %v1001_v42, %v998_v41  ;;  %v1623_v34 = vmul.f32 %v2375_v43, %v3598_v27 }
 0x269   : > { %v1007_v26 = vmul.f32 0.6931472, %v2377_v16  ;;  %1699 = vst.msk [vmem:[%s3142_s30 + $0x80] sm:$0xff] %vm1682_vm15, %v1674_v10  ;;  %vm1624_vm2 = vcmp.eq.f32.partialorder %v3598_v27, inf  ;;  %v1052_v6 = vsel %vm740_vm8, %v3918_v3, %v1004_v52  ;;  %v1621_v29 = vsel %vm1619_vm1, %v1620_v47, %v1618_v55 }
 0x26a   : > { %vm1626_vm3 = vcmp.eq.f32.partialorder %v3598_v27, 0.0  ;;  %v1627_v62 = vand.u32 2147483648, %v3598_v27  ;;  %v1269_v13 = vmul.f32 %v1052_v6, %v1052_v6  ;;  %v1676_v7 = vsel %vm1657_vm14, %v1243_v44, %v1621_v29 }
 0x26b   : > { %v1013_v12 = vsel %vm3635_vm11, %v1010_v54, %v1007_v26  ;;  %v1625_v37 = vsel %vm1624_vm2, %v3598_v27, %v1623_v34  ;;  %v2379_v17 = vpop.eup %2378  ;;  %v1242_v28 = vadd.f32 %v3613_v25, %v2938_v5  ;;  %1701 = vst.msk [vmem:[%s3142_s30 + $0x90] sm:$0xff] %vm1682_vm15, %v1676_v7  ;;  %vm1610_vm4 = vcmp.eq.f32.partialorder %v3625_v0, inf  ;;  %v1224_v42 = vpop.xlane.xlu0 %1223 }
 0x26c   : > { %v1053_v23 = vsel %vm741_vm10, %v3921_v33, %v1013_v12  ;;  %v1628_v53 = vsel %vm1626_vm3, %v1627_v62, %v1625_v37  ;;  %v1485_v11 = vadd.f32 %v3565_v58, %v1269_v13  ;;  %v1609_v1 = vmul.f32 %v2379_v17, %v3625_v0  ;;  %v1221_v58 = vpop.xlane.xlu1 %1220 }
 0x26d   : > { %v1270_v24 = vmul.f32 %v1053_v23, %v1053_v23  ;;  %v1677_v14 = vsel %vm1657_vm14, %v1244_v48, %v1628_v53  ;;  %v1613_v27 = vand.u32 2147483648, %v3625_v0  ;;  %vm1612_vm5 = vcmp.eq.f32.partialorder %v3625_v0, 0.0 }
 0x26e   : > { %1702 = vst.msk [vmem:[%s3142_s30 + $0x98] sm:$0xff] %vm1682_vm15, %v1677_v14  ;;  %2384 = vrsqrt.f32 %v1485_v11  ;;  %v1611_v25 = vsel %vm1610_vm4, %v3625_v0, %v1609_v1  ;;  %v1247_v50 = vadd.f32 %v1221_v58, %v2966_v19  ;;  %vm1645_vm6 = vcmp.eq.f32.partialorder %v3655_v46, inf }
 0x26f   : > { %v1486_v5 = vadd.f32 %v3585_v61, %v1270_v24  ;;  %v2381_v32 = vpop.eup %2380  ;;  %v1614_v15 = vsel %vm1612_vm5, %v1613_v27, %v1611_v25  ;;  %v1648_v61 = vand.u32 2147483648, %v3655_v46  ;;  %v1248_v0 = vadd.f32 %v1224_v42, %v2981_v51 }
 0x270   : > { %v1675_v18 = vsel %vm1657_vm14, %v1242_v28, %v1614_v15  ;;  %v1644_v38 = vmul.f32 %v2381_v32, %v3655_v46  ;;  %vm1647_vm7 = vcmp.eq.f32.partialorder %v3655_v46, 0.0  ;;  %vm1652_vm8 = vcmp.eq.f32.partialorder %v3667_v31, inf }
 0x271   : > { %2386 = vrsqrt.f32 %v1486_v5  ;;  %1700 = vst.msk [vmem:[%s3142_s30 + $0x88] sm:$0xff] %vm1682_vm15, %v1675_v18  ;;  %v1655_v45 = vand.u32 2147483648, %v3667_v31  ;;  %vm1654_vm9 = vcmp.eq.f32.partialorder %v3667_v31, 0.0  ;;  %vm1631_vm10 = vcmp.eq.f32.partialorder %v1485_v11, inf }
 0x272   : > { %v2383_v21 = vpop.eup %2382  ;;  %v1646_v36 = vsel %vm1645_vm6, %v3655_v46, %v1644_v38  ;;  %v1634_v4 = vand.u32 2147483648, %v1485_v11  ;;  %v1245_v40 = vadd.f32 %v1215_v20, %v3918_v3  ;;  %vm1633_vm11 = vcmp.eq.f32.partialorder %v1485_v11, 0.0 }
 0x273   : > { %v1651_v56 = vmul.f32 %v2383_v21, %v3667_v31  ;;  %v1649_v19 = vsel %vm1647_vm7, %v1648_v61, %v1646_v36  ;;  %vm1638_vm12 = vcmp.eq.f32.partialorder %v1486_v5, inf  ;;  %v1641_v44 = vand.u32 2147483648, %v1486_v5 }
 0x274   : > { %v1680_v22 = vsel %vm1657_vm14, %v1247_v50, %v1649_v19  ;;  %v1246_v8 = vadd.f32 %v1218_v30, %v3921_v33  ;;  %vm1640_vm13 = vcmp.eq.f32.partialorder %v1486_v5, 0.0 }
 0x275   : > { %v1653_v59 = vsel %vm1652_vm8, %v3667_v31, %v1651_v56  ;;  %1705 = vst.msk [vmem:[%s3142_s30 + $0xb0] sm:$0xff] %vm1682_vm15, %v1680_v22 }
 0x276   : > { %v1656_v63 = vsel %vm1654_vm9, %v1655_v45, %v1653_v59 }
 0x277   : > { %v1681_v51 = vsel %vm1657_vm14, %v1248_v0, %v1656_v63 }
 0x278   : > { %1706 = vst.msk [vmem:[%s3142_s30 + $0xb8] sm:$0xff] %vm1682_vm15, %v1681_v51  ;;  %v2385_v54 = vpop.eup %2384 }
 0x279   : > { %v1630_v2 = vmul.f32 %v2385_v54, %v1485_v11 }
 0x27b   : > { %v2387_v46 = vpop.eup %2386  ;;  %v1632_v57 = vsel %vm1631_vm10, %v1485_v11, %v1630_v2  ;;  %1713 = sbr.rel (!%p2537_p4) target bundleno = 706 (0x2c2), region = 44 }
 0x27c   : > { %v1637_v60 = vmul.f32 %v2387_v46, %v1486_v5  ;;  %v1635_v39 = vsel %vm1633_vm11, %v1634_v4, %v1632_v57 }
 0x27d   : > { %v1678_v9 = vsel %vm1657_vm14, %v1245_v40, %v1635_v39 }
 0x27e   : > { %v1639_v31 = vsel %vm1638_vm12, %v1486_v5, %v1637_v60  ;;  %1703 = vst.msk [vmem:[%s3142_s30 + $0xa0] sm:$0xff] %vm1682_vm15, %v1678_v9 }
 0x27f   : > { %v1642_v35 = vsel %vm1640_vm13, %v1641_v44, %v1639_v31 }
 0x280   : > { %v1679_v43 = vsel %vm1657_vm14, %v1246_v8, %v1642_v35 }
 0x281   : > { %1704 = vst.msk [vmem:[%s3142_s30 + $0xa8] sm:$0xff] %vm1682_vm15, %v1679_v43 }
 0x282   : > { %s3932_s6 = smov (!%p1716_p8, %s1715_s6), 24 }
 0x283   : > { %s2051_s11 = sshll.u32 %s3932_s6, 7 }
 0x284   : > { %p2054_p9 = scmp.eq.s32.totalorder %s2051_s11, 0 }
 0x285   : > { %2388 = sdivrem.u32 (!%p2054_p9), %s3932_s6, 24 }
 0x286   : > { %1724 = sbr.rel (%p2054_p9) target bundleno = 706 (0x2c2), region = 48 }
 0x28e   : > { %s3755_s26 = spop.drf %2388 }
 0x28f   : > { %p2055_p10 = scmp.le.s32.totalorder %s3755_s26, 0 }
 0x290   : > { %s3924_s21 = smov (!%p2055_p10), %s3749_s10  ;;  %s3925_s29 = smov (!%p2055_p10), %s3142_s30 }
 0x291   : > { %1972 = sbr.rel (%p2055_p10) target bundleno = 677 (0x2a5), region = 124  ;;  %s3764_s12 = smov (!%p2055_p10), 0  }
 0x292   : > { %s3766_s13 = smov (!%p2055_p10), 0  }
 0x298 LB: >> { %v1834_v3 = vld [vmem:[%s2454_s29] sm:$0xff]  ;;  %v1836_v33 = vld [vmem:[%s2454_s29 + $0x8] sm:$0xff]  ;;  %v1838_v41 = vld [vmem:[%s2454_s29 + $0x10] sm:$0xff]  ;;  %s1882_s14 = sadd.s32 1, %s2458_s12  ;;  %s1828_s13 = sadd.s32 1, %s2462_s13   ;;  %s2462_s13 = sphi %s3766_s13, %s1828_s13   ;;  %s2458_s12 = sphi %s3764_s12, %s3927_s12   ;;  %s2454_s29 = sphi %s3925_s29, %s1887_s29   ;;  %s2450_s21 = sphi %s3924_s21, %s3926_s21  }
 0x299   : >> { %1835 = vst [vmem:[%s2450_s21] sm:$0xff] %v1834_v3  ;;  %1837 = vst [vmem:[%s2450_s21 + $0x8] sm:$0xff] %v1836_v33  ;;  %v1840_v49 = vld [vmem:[%s2454_s29 + $0x18] sm:$0xff]  ;;  %v1842_v55 = vld [vmem:[%s2454_s29 + $0x20] sm:$0xff]  ;;  %p1883_p11 = scmp.ge.s32.totalorder %s1882_s14, %s3755_s26  ;;  %p1827_p12 = scmp.ge.s32.totalorder %s1828_s13, %s3755_s26 }
 0x29a   : >> { %1839 = vst [vmem:[%s2450_s21 + $0x10] sm:$0xff] %v1838_v41  ;;  %v1844_v16 = vld [vmem:[%s2454_s29 + $0x28] sm:$0xff]  ;;  %1841 = vst [vmem:[%s2450_s21 + $0x18] sm:$0xff] %v1840_v49  ;;  %v1846_v10 = vld [vmem:[%s2454_s29 + $0x30] sm:$0xff] }
 0x29b   : >> { %1843 = vst [vmem:[%s2450_s21 + $0x20] sm:$0xff] %v1842_v55  ;;  %1845 = vst [vmem:[%s2450_s21 + $0x28] sm:$0xff] %v1844_v16  ;;  %v1848_v47 = vld [vmem:[%s2454_s29 + $0x38] sm:$0xff]  ;;  %v1850_v48 = vld [vmem:[%s2454_s29 + $0x40] sm:$0xff]  ;;  %s3934_s14 = smov (%p1883_p11, %s1882_s14), 0 }
 0x29c   : >> { %1847 = vst [vmem:[%s2450_s21 + $0x30] sm:$0xff] %v1846_v10  ;;  %1849 = vst [vmem:[%s2450_s21 + $0x38] sm:$0xff] %v1848_v47  ;;  %v1852_v52 = vld [vmem:[%s2454_s29 + $0x48] sm:$0xff]  ;;  %v1854_v26 = vld [vmem:[%s2454_s29 + $0x50] sm:$0xff]  ;;  %s1885_s15 = smul.u32 192, %s3934_s14  ;;  %s3927_s12 = smov %s3934_s14 }
 0x29d   : >> { %1851 = vst [vmem:[%s2450_s21 + $0x40] sm:$0xff] %v1850_v48  ;;  %v1856_v34 = vld [vmem:[%s2454_s29 + $0x58] sm:$0xff]  ;;  %1853 = vst [vmem:[%s2450_s21 + $0x48] sm:$0xff] %v1852_v52  ;;  %v1858_v20 = vld [vmem:[%s2454_s29 + $0x60] sm:$0xff] }
 0x29e   : >> { %1855 = vst [vmem:[%s2450_s21 + $0x50] sm:$0xff] %v1854_v26  ;;  %1857 = vst [vmem:[%s2450_s21 + $0x58] sm:$0xff] %v1856_v34  ;;  %v1860_v6 = vld [vmem:[%s2454_s29 + $0x68] sm:$0xff]  ;;  %v1862_v29 = vld [vmem:[%s2454_s29 + $0x70] sm:$0xff]  ;;  %s1888_s16 = scalar_lea.vmem %s3749_s10, %s1885_s15   ;;  %1830 = sbr.rel (!%p1827_p12) target bundleno = 664 (0x298), region = 130 }
 0x29f   : >> { %1859 = vst [vmem:[%s2450_s21 + $0x60] sm:$0xff] %v1858_v20  ;;  %1861 = vst [vmem:[%s2450_s21 + $0x68] sm:$0xff] %v1860_v6  ;;  %v1864_v62 = vld [vmem:[%s2454_s29 + $0x78] sm:$0xff]  ;;  %v1866_v30 = vld [vmem:[%s2454_s29 + $0x80] sm:$0xff] }
 0x2a0   : >> { %1863 = vst [vmem:[%s2450_s21 + $0x70] sm:$0xff] %v1862_v29  ;;  %v1868_v13 = vld [vmem:[%s2454_s29 + $0x88] sm:$0xff]  ;;  %1865 = vst [vmem:[%s2450_s21 + $0x78] sm:$0xff] %v1864_v62  ;;  %v1870_v12 = vld [vmem:[%s2454_s29 + $0x90] sm:$0xff] }
 0x2a1   : >> { %1867 = vst [vmem:[%s2450_s21 + $0x80] sm:$0xff] %v1866_v30  ;;  %1869 = vst [vmem:[%s2450_s21 + $0x88] sm:$0xff] %v1868_v13  ;;  %v1872_v7 = vld [vmem:[%s2454_s29 + $0x98] sm:$0xff]  ;;  %v1874_v37 = vld [vmem:[%s2454_s29 + $0xa0] sm:$0xff] }
 0x2a2   : >> { %1871 = vst [vmem:[%s2450_s21 + $0x90] sm:$0xff] %v1870_v12  ;;  %1873 = vst [vmem:[%s2450_s21 + $0x98] sm:$0xff] %v1872_v7  ;;  %v1876_v17 = vld [vmem:[%s2454_s29 + $0xa8] sm:$0xff]  ;;  %v1878_v23 = vld [vmem:[%s2454_s29 + $0xb0] sm:$0xff] }
 0x2a3   : >> { %1875 = vst [vmem:[%s2450_s21 + $0xa0] sm:$0xff] %v1874_v37  ;;  %v1880_v28 = vld [vmem:[%s2454_s29 + $0xb8] sm:$0xff]  ;;  %s1887_s29 = scalar_lea.vmem %s3142_s30, %s1885_s15 [#allocation2]   ;;  %1877 = vst [vmem:[%s2450_s21 + $0xa8] sm:$0xff] %v1876_v17 }
 0x2a4   : >> { %1879 = vst [vmem:[%s2450_s21 + $0xb0] sm:$0xff] %v1878_v23  ;;  %1881 = vst [vmem:[%s2450_s21 + $0xb8] sm:$0xff] %v1880_v28  ;;  %s3926_s21 = smov %s1888_s16 }
 0x2a5 PF: > { %2390 = sdivrem.u32 %s3932_s6, 24 }
 0x2a6   : > { %s2056_s17 = smul.u32 192, %s3755_s26 }
 0x2a8   : > { %s1893_s20 = scalar_lea.vmem %s3142_s30, %s2056_s17 [#allocation2]   ;;  %s1895_s23 = scalar_lea.vmem %s3749_s10, %s2056_s17  }
 0x2ae   : > { %s2391_s24 = spop.drf %2390 }
 0x2af   : > { %p2058_p13 = scmp.le.s32.totalorder %s2391_s24, 0 }
 0x2b0   : > { %s2464_s27 = smov (!%p2058_p13), %s1895_s23   ;;  %s2468_s28 = smov (!%p2058_p13), %s1893_s20  }
 0x2b1   : > { %1986 = sbr.rel (%p2058_p13) target bundleno = 706 (0x2c2), region = 135  ;;  %s2472_s18 = smov (!%p2058_p13), 0  }
 0x2b2   : > { %s2476_s7 = smov (!%p2058_p13), 0  }
 0x2b8 LB: >> { %v1905_v53 = vld [vmem:[%s2470_s28] sm:$0xff]  ;;  %s1907_s8 = sadd.s32 1, %s2474_s18  ;;  %s1899_s7 = sadd.s32 1, %s2478_s7   ;;  %s2478_s7 = sphi %s2476_s7, %s1899_s7   ;;  %s2474_s18 = sphi %s2472_s18, %s2473_s18   ;;  %s2470_s28 = sphi %s2468_s28, %s1912_s28   ;;  %s2466_s27 = sphi %s2464_s27, %s1913_s27  }
 0x2b9   : >> { %1906 = vst [vmem:[%s2466_s27] sm:$0xff] %v1905_v53  ;;  %p1908_p0 = scmp.ge.s32.totalorder %s1907_s8, %s2391_s24  ;;  %p1898_p1 = scmp.ge.s32.totalorder %s1899_s7, %s2391_s24 }
 0x2bb   : >> { %s3936_s8 = smov (%p1908_p0, %s1907_s8), 0  ;;  %1901 = sbr.rel (!%p1898_p1) target bundleno = 696 (0x2b8), region = 141 }
 0x2bc   : >> { %s2059_s30 = sshll.u32 %s3936_s8, 3  ;;  %s2473_s18 = smov %s3936_s8  }
 0x2bd   : >> { %s1912_s28 = scalar_lea.vmem %s1893_s20, %s2059_s30 [#allocation2]   ;;  %s1913_s27 = scalar_lea.vmem %s1895_s23, %s2059_s30  }
 0x2c2 PF: > { %p12_p2 = scmp.ge.s32.totalorder %s2527_s22, 4   ;;  %s3928_s18 = smov %s2442_s19 }
 0x2c3   : > { %s3929_s19 = smov %s2535_s25  ;;  %s3930_s20 = smov %s2527_s22 }
 0x2c4   :  { %14 = sbr.rel (!%p12_p2) target bundleno = 2 (0x2), region = 152 }

</bundles_post_ra>
